<compile_context>
chip_gen: v5e
topology: v5e:2x2
jax: 0.10.0
libtpu: 0.0.40
codegen_flags: <defaults>
</compile_context>

<pallas_src>
import functools

import jax
import jax.numpy as jnp
from jax.experimental import pallas as pl
from jax.experimental.pallas import tpu as pltpu

# Conv hyper-params from the module: Conv2d(3, 16, 7, stride=2, padding=3)
C_IN, C_OUT, KH, KW, STRIDE, PAD = 3, 16, 7, 7, 2, 3
C_PAD = 4                      # channels zero-padded 3 -> 4
N_PLANES = 4                   # stride-2 (row, col) parity planes
K = KH * KW * C_PAD            # 196 contraction rows; zero rows match zero weight cols
_LANE = 128
_MAX_NN = 8192                 # lane budget per grid step (pt scratch ~= 800 * NN bytes)


def _round_up(a, m):
    return (a + m - 1) // m * m


def _cdiv(a, b):
    return (a + b - 1) // b


def _conv_kernel(x_ref, w_ref, b_ref, o_ref, pt_ref, *, whp, nn):
    # x_ref : [1, 1, 16, band_L]  one halo'd row band of the flattened parity planes
    #         x_ref[0, 0, plane*4 + c, r*whp + q] == x_padded[c, 2*(band_row0+r)+rp, 2*q+cp]
    #         with plane = 2*rp + cp
    # w_ref : [16, 196]           weight, rows of P ordered (kh, kw, c)
    # b_ref : [16, 1]
    # o_ref : [1, 16, nn]         nn = oh_tile * whp (lane-dense, multiple of 128)
    # pt_ref: [196, nn]           VMEM scratch: transposed patch matrix P^T

    # ---- in-VMEM im2col: each tap is ONE contiguous, static-offset slice copy -------
    for kh in range(KH):
        for kw in range(KW):
            tap = kh * KW + kw
            plane = (kh % 2) * 2 + (kw % 2)           # row/col parity plane
            start = (kh // 2) * whp + (kw // 2)       # static flat offset inside the band
            pt_ref[pl.ds(tap * C_PAD, C_PAD), :] = (
                x_ref[0, 0, pl.ds(plane * C_PAD, C_PAD), pl.ds(start, nn)])

    # ---- single fused MXU matmul + bias + one dense full-block store ----------------
    acc = jnp.dot(w_ref[...], pt_ref[...], preferred_element_type=jnp.float32)
    o_ref[0] = (acc + b_ref[...]).astype(o_ref.dtype)


def _pick_band(oh, whp, max_nn=_MAX_NN):
    """(oh_tile, n_bands): oh_tile multiple of 8 (so oh_tile*whp % 128 == 0),
    sized against a lane/VMEM budget, with minimal last-band padding."""
    budget_t = max(8, (max_nn // whp) // 8 * 8)
    n_bands = max(1, _cdiv(oh, budget_t))
    oh_tile = _round_up(_cdiv(oh, n_bands), 8)
    return oh_tile, n_bands


def single_layer_forward(x, weight, bias):
    """Conv2d(3, 16, 7, stride=2, padding=3) forward as a Pallas TPU kernel.

    x:      [N, 3, H, W]   (NCHW, float32)
    weight: [16, 3, 7, 7]  (PyTorch OIHW layout)
    bias:   [16]
    returns [N, 16, OH, OW] (NCHW)
    """
    n, c, h, w = x.shape
    assert c == C_IN
    oh = (h + 2 * PAD - KH) // STRIDE + 1
    ow = (w + 2 * PAD - KW) // STRIDE + 1
    wh = ow + 3                                 # parity-plane width incl. kw//2 halo
    whp = _round_up(wh, 16)                     # plane row pitch; (mult of 8)*whp % 128 == 0
    oh_tile, n_bands = _pick_band(oh, whp)
    oh_pad = oh_tile * n_bands                  # never a full-OH fallback tile
    nn = oh_tile * whp                          # lanes per grid step (multiple of 128)
    bh = oh_tile + 4                            # band rows: kh//2 halo (3) + 1 slack row
    hhp = oh_pad + 4                            # parity-plane rows needed by all bands
    band_l = bh * whp

    # ---- host-side layout prep (all input-sized, no HBM im2col) ---------------------
    # channels 3 -> 4, conv zero-padding, round spatial up so the parity split is uniform
    xp = jnp.pad(x, ((0, 0), (0, C_PAD - C_IN),
                     (PAD, 2 * hhp - h - PAD), (PAD, 2 * whp - w - PAD)))
    # parity split: xs4[n, (2*rp+cp)*4 + c, i, q] = xp[n, c, 2*i+rp, 2*q+cp]
    xs4 = (xp.reshape(n, C_PAD, hhp, 2, whp, 2)
             .transpose(0, 3, 5, 1, 2, 4)
             .reshape(n, N_PLANES * C_PAD, hhp, whp))
    # halo'd row bands (overlap = 4 rows) so each grid step's input block is small and
    # all in-kernel offsets are static; flatten (rows, cols) at pitch whp.
    row_idx = (jnp.arange(n_bands) * oh_tile)[:, None] + jnp.arange(bh)[None, :]
    xb = xs4[:, :, row_idx, :]                              # (n, 16, n_bands, bh, whp)
    xb = jnp.transpose(xb, (0, 2, 1, 3, 4)).reshape(n, n_bands, N_PLANES * C_PAD, band_l)

    # weight [16,3,7,7] -> [16, 196], columns ordered (kh, kw, c), c zero-padded 3 -> 4
    w_mat = jnp.pad(jnp.transpose(weight, (0, 2, 3, 1)),
                    ((0, 0), (0, 0), (0, 0), (0, C_PAD - C_IN))).reshape(C_OUT, K)
    b_mat = bias.reshape(C_OUT, 1).astype(jnp.float32)

    kernel = functools.partial(_conv_kernel, whp=whp, nn=nn)
    out_flat = pl.pallas_call(
        kernel,
        out_shape=jax.ShapeDtypeStruct((n, C_OUT, oh_pad * whp), jnp.float32),
        grid_spec=pltpu.PrefetchScalarGridSpec(
            num_scalar_prefetch=0,
            grid=(n, n_bands),
            in_specs=[
                pl.BlockSpec((1, 1, N_PLANES * C_PAD, band_l),
                             lambda nb, jb: (nb, jb, 0, 0)),
                pl.BlockSpec((C_OUT, K), lambda nb, jb: (0, 0)),
                pl.BlockSpec((C_OUT, 1), lambda nb, jb: (0, 0)),
            ],
            out_specs=pl.BlockSpec((1, C_OUT, nn), lambda nb, jb: (nb, 0, jb)),
            scratch_shapes=[pltpu.VMEM((K, nn), jnp.float32)],
        ),
        compiler_params=pltpu.CompilerParams(
            dimension_semantics=("parallel", "parallel"),
            vmem_limit_bytes=48 * 1024 * 1024),
    )(xb, w_mat, b_mat)

    # free-ish epilogue: un-flatten and drop the halo / padded rows & columns
    out = out_flat.reshape(n, C_OUT, oh_pad, whp)[:, :, :oh, :ow]
    return out
    # TODO(synk): for extremely wide images (OW >> 2048) also tile the width axis
    # (a second band split along columns) to keep nn near the lane/VMEM budget.


def _init_params(key):
    """Deterministic init mimicking torch.nn.Conv2d default (uniform +/- 1/sqrt(fan_in))."""
    kw_key, kb_key = jax.random.split(key)
    fan_in = C_IN * KH * KW
    bound = 1.0 / jnp.sqrt(fan_in)
    weight = jax.random.uniform(kw_key, (C_OUT, C_IN, KH, KW), jnp.float32, -bound, bound)
    bias = jax.random.uniform(kb_key, (C_OUT,), jnp.float32, -bound, bound)
    return weight, bias


if __name__ == "__main__":
    key = jax.random.PRNGKey(0)
    kx, kp = jax.random.split(key)

    # small NCHW input consistent with in_channels=3
    x = jax.random.normal(kx, (2, 3, 16, 16), jnp.float32)
    weight, bias = _init_params(kp)

    out = jax.block_until_ready(single_layer_forward(x, weight, bias))

    # reference check against XLA conv
    ref = jax.lax.conv_general_dilated(
        x, weight,
        window_strides=(STRIDE, STRIDE),
        padding=((PAD, PAD), (PAD, PAD)),
        dimension_numbers=("NCHW", "OIHW", "NCHW"),
    ) + bias.reshape(1, C_OUT, 1, 1)

    assert out.shape == (2, C_OUT, 8, 8), out.shape
    max_err = float(jnp.max(jnp.abs(out - ref)))
    assert max_err < 1e-3, max_err

    print("KERNEL_OK")
</pallas_src>

<mosaic_0001>
module attributes {stable_mosaic.version = 11 : i64} {
  func.func @_conv_kernel(%arg0: i32, %arg1: i32, %arg2: memref<1x1x16x192xf32, #tpu.memory_space<vmem>>, %arg3: memref<16x196xf32, #tpu.memory_space<vmem>>, %arg4: memref<16x1xf32, #tpu.memory_space<vmem>>, %arg5: memref<1x16x128xf32, #tpu.memory_space<vmem>>, %arg6: memref<196x128xf32, #tpu.memory_space<vmem>>) attributes {dimension_semantics = [#tpu.dimension_semantics<parallel>, #tpu.dimension_semantics<parallel>], iteration_bounds = array<i64: 2, 1>, scalar_prefetch = 0 : i64, scratch_operands = 1 : i64, tpu.core_type = #tpu.core_type<tc>, window_params = [{transform_indices = @transform_0, window_bounds = array<i64: 1, 1, 16, 192>}, {pipeline_mode = #tpu.pipeline_mode<synchronous>, transform_indices = @transform_1, window_bounds = array<i64: 16, 196>}, {pipeline_mode = #tpu.pipeline_mode<synchronous>, transform_indices = @transform_2, window_bounds = array<i64: 16, 1>}, {transform_indices = @transform_3, window_bounds = array<i64: 1, 16, 128>}]} {
    %c0 = arith.constant 0 : index
    %c0_0 = arith.constant 0 : index
    %c0_1 = arith.constant 0 : index
    %c0_2 = arith.constant 0 : index
    %0 = vector.load %arg2[%c0, %c0_0, %c0_1, %c0_2] : memref<1x1x16x192xf32, #tpu.memory_space<vmem>>, vector<1x1x4x128xf32>
    %1 = vector.shape_cast %0 : vector<1x1x4x128xf32> to vector<4x128xf32>
    %c0_3 = arith.constant 0 : index
    %c0_4 = arith.constant 0 : index
    %2 = vector.load %arg6[%c0_3, %c0_4] : memref<196x128xf32, #tpu.memory_space<vmem>>, vector<4x128xf32>
    tpu.vector_store %arg6[%c0_3, %c0_4], %1 {strides = array<i32>} : memref<196x128xf32, #tpu.memory_space<vmem>>, vector<4x128xf32>,
    %c0_5 = arith.constant 0 : index
    %c0_6 = arith.constant 0 : index
    %c4 = arith.constant 4 : index
    %c0_7 = arith.constant 0 : index
    %3 = vector.load %arg2[%c0_5, %c0_6, %c4, %c0_7] : memref<1x1x16x192xf32, #tpu.memory_space<vmem>>, vector<1x1x4x128xf32>
    %4 = vector.shape_cast %3 : vector<1x1x4x128xf32> to vector<4x128xf32>
    %c4_8 = arith.constant 4 : index
    %c0_9 = arith.constant 0 : index
    %5 = vector.load %arg6[%c4_8, %c0_9] : memref<196x128xf32, #tpu.memory_space<vmem>>, vector<4x128xf32>
    tpu.vector_store %arg6[%c4_8, %c0_9], %4 {strides = array<i32>} : memref<196x128xf32, #tpu.memory_space<vmem>>, vector<4x128xf32>,
    %c0_10 = arith.constant 0 : index
    %c0_11 = arith.constant 0 : index
    %c0_12 = arith.constant 0 : index
    %c1 = arith.constant 1 : index
    %6 = vector.load %arg2[%c0_10, %c0_11, %c0_12, %c1] : memref<1x1x16x192xf32, #tpu.memory_space<vmem>>, vector<1x1x4x128xf32>
    %7 = vector.shape_cast %6 : vector<1x1x4x128xf32> to vector<4x128xf32>
    %c8 = arith.constant 8 : index
    %c0_13 = arith.constant 0 : index
    %8 = vector.load %arg6[%c8, %c0_13] : memref<196x128xf32, #tpu.memory_space<vmem>>, vector<4x128xf32>
    tpu.vector_store %arg6[%c8, %c0_13], %7 {strides = array<i32>} : memref<196x128xf32, #tpu.memory_space<vmem>>, vector<4x128xf32>,
    %c0_14 = arith.constant 0 : index
    %c0_15 = arith.constant 0 : index
    %c4_16 = arith.constant 4 : index
    %c1_17 = arith.constant 1 : index
    %9 = vector.load %arg2[%c0_14, %c0_15, %c4_16, %c1_17] : memref<1x1x16x192xf32, #tpu.memory_space<vmem>>, vector<1x1x4x128xf32>
    %10 = vector.shape_cast %9 : vector<1x1x4x128xf32> to vector<4x128xf32>
    %c12 = arith.constant 12 : index
    %c0_18 = arith.constant 0 : index
    %11 = vector.load %arg6[%c12, %c0_18] : memref<196x128xf32, #tpu.memory_space<vmem>>, vector<4x128xf32>
    tpu.vector_store %arg6[%c12, %c0_18], %10 {strides = array<i32>} : memref<196x128xf32, #tpu.memory_space<vmem>>, vector<4x128xf32>,
    %c0_19 = arith.constant 0 : index
    %c0_20 = arith.constant 0 : index
    %c0_21 = arith.constant 0 : index
    %c2 = arith.constant 2 : index
    %12 = vector.load %arg2[%c0_19, %c0_20, %c0_21, %c2] : memref<1x1x16x192xf32, #tpu.memory_space<vmem>>, vector<1x1x4x128xf32>
    %13 = vector.shape_cast %12 : vector<1x1x4x128xf32> to vector<4x128xf32>
    %c16 = arith.constant 16 : index
    %c0_22 = arith.constant 0 : index
    %14 = vector.load %arg6[%c16, %c0_22] : memref<196x128xf32, #tpu.memory_space<vmem>>, vector<4x128xf32>
    tpu.vector_store %arg6[%c16, %c0_22], %13 {strides = array<i32>} : memref<196x128xf32, #tpu.memory_space<vmem>>, vector<4x128xf32>,
    %c0_23 = arith.constant 0 : index
    %c0_24 = arith.constant 0 : index
    %c4_25 = arith.constant 4 : index
    %c2_26 = arith.constant 2 : index
    %15 = vector.load %arg2[%c0_23, %c0_24, %c4_25, %c2_26] : memref<1x1x16x192xf32, #tpu.memory_space<vmem>>, vector<1x1x4x128xf32>
    %16 = vector.shape_cast %15 : vector<1x1x4x128xf32> to vector<4x128xf32>
    %c20 = arith.constant 20 : index
    %c0_27 = arith.constant 0 : index
    %17 = vector.load %arg6[%c20, %c0_27] : memref<196x128xf32, #tpu.memory_space<vmem>>, vector<4x128xf32>
    tpu.vector_store %arg6[%c20, %c0_27], %16 {strides = array<i32>} : memref<196x128xf32, #tpu.memory_space<vmem>>, vector<4x128xf32>,
    %c0_28 = arith.constant 0 : index
    %c0_29 = arith.constant 0 : index
    %c0_30 = arith.constant 0 : index
    %c3 = arith.constant 3 : index
    %18 = vector.load %arg2[%c0_28, %c0_29, %c0_30, %c3] : memref<1x1x16x192xf32, #tpu.memory_space<vmem>>, vector<1x1x4x128xf32>
    %19 = vector.shape_cast %18 : vector<1x1x4x128xf32> to vector<4x128xf32>
    %c24 = arith.constant 24 : index
    %c0_31 = arith.constant 0 : index
    %20 = vector.load %arg6[%c24, %c0_31] : memref<196x128xf32, #tpu.memory_space<vmem>>, vector<4x128xf32>
    tpu.vector_store %arg6[%c24, %c0_31], %19 {strides = array<i32>} : memref<196x128xf32, #tpu.memory_space<vmem>>, vector<4x128xf32>,
    %c0_32 = arith.constant 0 : index
    %c0_33 = arith.constant 0 : index
    %c8_34 = arith.constant 8 : index
    %c0_35 = arith.constant 0 : index
    %21 = vector.load %arg2[%c0_32, %c0_33, %c8_34, %c0_35] : memref<1x1x16x192xf32, #tpu.memory_space<vmem>>, vector<1x1x4x128xf32>
    %22 = vector.shape_cast %21 : vector<1x1x4x128xf32> to vector<4x128xf32>
    %c28 = arith.constant 28 : index
    %c0_36 = arith.constant 0 : index
    %23 = vector.load %arg6[%c28, %c0_36] : memref<196x128xf32, #tpu.memory_space<vmem>>, vector<4x128xf32>
    tpu.vector_store %arg6[%c28, %c0_36], %22 {strides = array<i32>} : memref<196x128xf32, #tpu.memory_space<vmem>>, vector<4x128xf32>,
    %c0_37 = arith.constant 0 : index
    %c0_38 = arith.constant 0 : index
    %c12_39 = arith.constant 12 : index
    %c0_40 = arith.constant 0 : index
    %24 = vector.load %arg2[%c0_37, %c0_38, %c12_39, %c0_40] : memref<1x1x16x192xf32, #tpu.memory_space<vmem>>, vector<1x1x4x128xf32>
    %25 = vector.shape_cast %24 : vector<1x1x4x128xf32> to vector<4x128xf32>
    %c32 = arith.constant 32 : index
    %c0_41 = arith.constant 0 : index
    %26 = vector.load %arg6[%c32, %c0_41] : memref<196x128xf32, #tpu.memory_space<vmem>>, vector<4x128xf32>
    tpu.vector_store %arg6[%c32, %c0_41], %25 {strides = array<i32>} : memref<196x128xf32, #tpu.memory_space<vmem>>, vector<4x128xf32>,
    %c0_42 = arith.constant 0 : index
    %c0_43 = arith.constant 0 : index
    %c8_44 = arith.constant 8 : index
    %c1_45 = arith.constant 1 : index
    %27 = vector.load %arg2[%c0_42, %c0_43, %c8_44, %c1_45] : memref<1x1x16x192xf32, #tpu.memory_space<vmem>>, vector<1x1x4x128xf32>
    %28 = vector.shape_cast %27 : vector<1x1x4x128xf32> to vector<4x128xf32>
    %c36 = arith.constant 36 : index
    %c0_46 = arith.constant 0 : index
    %29 = vector.load %arg6[%c36, %c0_46] : memref<196x128xf32, #tpu.memory_space<vmem>>, vector<4x128xf32>
    tpu.vector_store %arg6[%c36, %c0_46], %28 {strides = array<i32>} : memref<196x128xf32, #tpu.memory_space<vmem>>, vector<4x128xf32>,
    %c0_47 = arith.constant 0 : index
    %c0_48 = arith.constant 0 : index
    %c12_49 = arith.constant 12 : index
    %c1_50 = arith.constant 1 : index
    %30 = vector.load %arg2[%c0_47, %c0_48, %c12_49, %c1_50] : memref<1x1x16x192xf32, #tpu.memory_space<vmem>>, vector<1x1x4x128xf32>
    %31 = vector.shape_cast %30 : vector<1x1x4x128xf32> to vector<4x128xf32>
    %c40 = arith.constant 40 : index
    %c0_51 = arith.constant 0 : index
    %32 = vector.load %arg6[%c40, %c0_51] : memref<196x128xf32, #tpu.memory_space<vmem>>, vector<4x128xf32>
    tpu.vector_store %arg6[%c40, %c0_51], %31 {strides = array<i32>} : memref<196x128xf32, #tpu.memory_space<vmem>>, vector<4x128xf32>,
    %c0_52 = arith.constant 0 : index
    %c0_53 = arith.constant 0 : index
    %c8_54 = arith.constant 8 : index
    %c2_55 = arith.constant 2 : index
    %33 = vector.load %arg2[%c0_52, %c0_53, %c8_54, %c2_55] : memref<1x1x16x192xf32, #tpu.memory_space<vmem>>, vector<1x1x4x128xf32>
    %34 = vector.shape_cast %33 : vector<1x1x4x128xf32> to vector<4x128xf32>
    %c44 = arith.constant 44 : index
    %c0_56 = arith.constant 0 : index
    %35 = vector.load %arg6[%c44, %c0_56] : memref<196x128xf32, #tpu.memory_space<vmem>>, vector<4x128xf32>
    tpu.vector_store %arg6[%c44, %c0_56], %34 {strides = array<i32>} : memref<196x128xf32, #tpu.memory_space<vmem>>, vector<4x128xf32>,
    %c0_57 = arith.constant 0 : index
    %c0_58 = arith.constant 0 : index
    %c12_59 = arith.constant 12 : index
    %c2_60 = arith.constant 2 : index
    %36 = vector.load %arg2[%c0_57, %c0_58, %c12_59, %c2_60] : memref<1x1x16x192xf32, #tpu.memory_space<vmem>>, vector<1x1x4x128xf32>
    %37 = vector.shape_cast %36 : vector<1x1x4x128xf32> to vector<4x128xf32>
    %c48 = arith.constant 48 : index
    %c0_61 = arith.constant 0 : index
    %38 = vector.load %arg6[%c48, %c0_61] : memref<196x128xf32, #tpu.memory_space<vmem>>, vector<4x128xf32>
    tpu.vector_store %arg6[%c48, %c0_61], %37 {strides = array<i32>} : memref<196x128xf32, #tpu.memory_space<vmem>>, vector<4x128xf32>,
    %c0_62 = arith.constant 0 : index
    %c0_63 = arith.constant 0 : index
    %c8_64 = arith.constant 8 : index
    %c3_65 = arith.constant 3 : index
    %39 = vector.load %arg2[%c0_62, %c0_63, %c8_64, %c3_65] : memref<1x1x16x192xf32, #tpu.memory_space<vmem>>, vector<1x1x4x128xf32>
    %40 = vector.shape_cast %39 : vector<1x1x4x128xf32> to vector<4x128xf32>
    %c52 = arith.constant 52 : index
    %c0_66 = arith.constant 0 : index
    %41 = vector.load %arg6[%c52, %c0_66] : memref<196x128xf32, #tpu.memory_space<vmem>>, vector<4x128xf32>
    tpu.vector_store %arg6[%c52, %c0_66], %40 {strides = array<i32>} : memref<196x128xf32, #tpu.memory_space<vmem>>, vector<4x128xf32>,
    %c0_67 = arith.constant 0 : index
    %c0_68 = arith.constant 0 : index
    %c0_69 = arith.constant 0 : index
    %c16_70 = arith.constant 16 : index
    %42 = vector.load %arg2[%c0_67, %c0_68, %c0_69, %c16_70] : memref<1x1x16x192xf32, #tpu.memory_space<vmem>>, vector<1x1x4x128xf32>
    %43 = vector.shape_cast %42 : vector<1x1x4x128xf32> to vector<4x128xf32>
    %c56 = arith.constant 56 : index
    %c0_71 = arith.constant 0 : index
    %44 = vector.load %arg6[%c56, %c0_71] : memref<196x128xf32, #tpu.memory_space<vmem>>, vector<4x128xf32>
    tpu.vector_store %arg6[%c56, %c0_71], %43 {strides = array<i32>} : memref<196x128xf32, #tpu.memory_space<vmem>>, vector<4x128xf32>,
    %c0_72 = arith.constant 0 : index
    %c0_73 = arith.constant 0 : index
    %c4_74 = arith.constant 4 : index
    %c16_75 = arith.constant 16 : index
    %45 = vector.load %arg2[%c0_72, %c0_73, %c4_74, %c16_75] : memref<1x1x16x192xf32, #tpu.memory_space<vmem>>, vector<1x1x4x128xf32>
    %46 = vector.shape_cast %45 : vector<1x1x4x128xf32> to vector<4x128xf32>
    %c60 = arith.constant 60 : index
    %c0_76 = arith.constant 0 : index
    %47 = vector.load %arg6[%c60, %c0_76] : memref<196x128xf32, #tpu.memory_space<vmem>>, vector<4x128xf32>
    tpu.vector_store %arg6[%c60, %c0_76], %46 {strides = array<i32>} : memref<196x128xf32, #tpu.memory_space<vmem>>, vector<4x128xf32>,
    %c0_77 = arith.constant 0 : index
    %c0_78 = arith.constant 0 : index
    %c0_79 = arith.constant 0 : index
    %c17 = arith.constant 17 : index
    %48 = vector.load %arg2[%c0_77, %c0_78, %c0_79, %c17] : memref<1x1x16x192xf32, #tpu.memory_space<vmem>>, vector<1x1x4x128xf32>
    %49 = vector.shape_cast %48 : vector<1x1x4x128xf32> to vector<4x128xf32>
    %c64 = arith.constant 64 : index
    %c0_80 = arith.constant 0 : index
    %50 = vector.load %arg6[%c64, %c0_80] : memref<196x128xf32, #tpu.memory_space<vmem>>, vector<4x128xf32>
    tpu.vector_store %arg6[%c64, %c0_80], %49 {strides = array<i32>} : memref<196x128xf32, #tpu.memory_space<vmem>>, vector<4x128xf32>,
    %c0_81 = arith.constant 0 : index
    %c0_82 = arith.constant 0 : index
    %c4_83 = arith.constant 4 : index
    %c17_84 = arith.constant 17 : index
    %51 = vector.load %arg2[%c0_81, %c0_82, %c4_83, %c17_84] : memref<1x1x16x192xf32, #tpu.memory_space<vmem>>, vector<1x1x4x128xf32>
    %52 = vector.shape_cast %51 : vector<1x1x4x128xf32> to vector<4x128xf32>
    %c68 = arith.constant 68 : index
    %c0_85 = arith.constant 0 : index
    %53 = vector.load %arg6[%c68, %c0_85] : memref<196x128xf32, #tpu.memory_space<vmem>>, vector<4x128xf32>
    tpu.vector_store %arg6[%c68, %c0_85], %52 {strides = array<i32>} : memref<196x128xf32, #tpu.memory_space<vmem>>, vector<4x128xf32>,
    %c0_86 = arith.constant 0 : index
    %c0_87 = arith.constant 0 : index
    %c0_88 = arith.constant 0 : index
    %c18 = arith.constant 18 : index
    %54 = vector.load %arg2[%c0_86, %c0_87, %c0_88, %c18] : memref<1x1x16x192xf32, #tpu.memory_space<vmem>>, vector<1x1x4x128xf32>
    %55 = vector.shape_cast %54 : vector<1x1x4x128xf32> to vector<4x128xf32>
    %c72 = arith.constant 72 : index
    %c0_89 = arith.constant 0 : index
    %56 = vector.load %arg6[%c72, %c0_89] : memref<196x128xf32, #tpu.memory_space<vmem>>, vector<4x128xf32>
    tpu.vector_store %arg6[%c72, %c0_89], %55 {strides = array<i32>} : memref<196x128xf32, #tpu.memory_space<vmem>>, vector<4x128xf32>,
    %c0_90 = arith.constant 0 : index
    %c0_91 = arith.constant 0 : index
    %c4_92 = arith.constant 4 : index
    %c18_93 = arith.constant 18 : index
    %57 = vector.load %arg2[%c0_90, %c0_91, %c4_92, %c18_93] : memref<1x1x16x192xf32, #tpu.memory_space<vmem>>, vector<1x1x4x128xf32>
    %58 = vector.shape_cast %57 : vector<1x1x4x128xf32> to vector<4x128xf32>
    %c76 = arith.constant 76 : index
    %c0_94 = arith.constant 0 : index
    %59 = vector.load %arg6[%c76, %c0_94] : memref<196x128xf32, #tpu.memory_space<vmem>>, vector<4x128xf32>
    tpu.vector_store %arg6[%c76, %c0_94], %58 {strides = array<i32>} : memref<196x128xf32, #tpu.memory_space<vmem>>, vector<4x128xf32>,
    %c0_95 = arith.constant 0 : index
    %c0_96 = arith.constant 0 : index
    %c0_97 = arith.constant 0 : index
    %c19 = arith.constant 19 : index
    %60 = vector.load %arg2[%c0_95, %c0_96, %c0_97, %c19] : memref<1x1x16x192xf32, #tpu.memory_space<vmem>>, vector<1x1x4x128xf32>
    %61 = vector.shape_cast %60 : vector<1x1x4x128xf32> to vector<4x128xf32>
    %c80 = arith.constant 80 : index
    %c0_98 = arith.constant 0 : index
    %62 = vector.load %arg6[%c80, %c0_98] : memref<196x128xf32, #tpu.memory_space<vmem>>, vector<4x128xf32>
    tpu.vector_store %arg6[%c80, %c0_98], %61 {strides = array<i32>} : memref<196x128xf32, #tpu.memory_space<vmem>>, vector<4x128xf32>,
    %c0_99 = arith.constant 0 : index
    %c0_100 = arith.constant 0 : index
    %c8_101 = arith.constant 8 : index
    %c16_102 = arith.constant 16 : index
    %63 = vector.load %arg2[%c0_99, %c0_100, %c8_101, %c16_102] : memref<1x1x16x192xf32, #tpu.memory_space<vmem>>, vector<1x1x4x128xf32>
    %64 = vector.shape_cast %63 : vector<1x1x4x128xf32> to vector<4x128xf32>
    %c84 = arith.constant 84 : index
    %c0_103 = arith.constant 0 : index
    %65 = vector.load %arg6[%c84, %c0_103] : memref<196x128xf32, #tpu.memory_space<vmem>>, vector<4x128xf32>
    tpu.vector_store %arg6[%c84, %c0_103], %64 {strides = array<i32>} : memref<196x128xf32, #tpu.memory_space<vmem>>, vector<4x128xf32>,
    %c0_104 = arith.constant 0 : index
    %c0_105 = arith.constant 0 : index
    %c12_106 = arith.constant 12 : index
    %c16_107 = arith.constant 16 : index
    %66 = vector.load %arg2[%c0_104, %c0_105, %c12_106, %c16_107] : memref<1x1x16x192xf32, #tpu.memory_space<vmem>>, vector<1x1x4x128xf32>
    %67 = vector.shape_cast %66 : vector<1x1x4x128xf32> to vector<4x128xf32>
    %c88 = arith.constant 88 : index
    %c0_108 = arith.constant 0 : index
    %68 = vector.load %arg6[%c88, %c0_108] : memref<196x128xf32, #tpu.memory_space<vmem>>, vector<4x128xf32>
    tpu.vector_store %arg6[%c88, %c0_108], %67 {strides = array<i32>} : memref<196x128xf32, #tpu.memory_space<vmem>>, vector<4x128xf32>,
    %c0_109 = arith.constant 0 : index
    %c0_110 = arith.constant 0 : index
    %c8_111 = arith.constant 8 : index
    %c17_112 = arith.constant 17 : index
    %69 = vector.load %arg2[%c0_109, %c0_110, %c8_111, %c17_112] : memref<1x1x16x192xf32, #tpu.memory_space<vmem>>, vector<1x1x4x128xf32>
    %70 = vector.shape_cast %69 : vector<1x1x4x128xf32> to vector<4x128xf32>
    %c92 = arith.constant 92 : index
    %c0_113 = arith.constant 0 : index
    %71 = vector.load %arg6[%c92, %c0_113] : memref<196x128xf32, #tpu.memory_space<vmem>>, vector<4x128xf32>
    tpu.vector_store %arg6[%c92, %c0_113], %70 {strides = array<i32>} : memref<196x128xf32, #tpu.memory_space<vmem>>, vector<4x128xf32>,
    %c0_114 = arith.constant 0 : index
    %c0_115 = arith.constant 0 : index
    %c12_116 = arith.constant 12 : index
    %c17_117 = arith.constant 17 : index
    %72 = vector.load %arg2[%c0_114, %c0_115, %c12_116, %c17_117] : memref<1x1x16x192xf32, #tpu.memory_space<vmem>>, vector<1x1x4x128xf32>
    %73 = vector.shape_cast %72 : vector<1x1x4x128xf32> to vector<4x128xf32>
    %c96 = arith.constant 96 : index
    %c0_118 = arith.constant 0 : index
    %74 = vector.load %arg6[%c96, %c0_118] : memref<196x128xf32, #tpu.memory_space<vmem>>, vector<4x128xf32>
    tpu.vector_store %arg6[%c96, %c0_118], %73 {strides = array<i32>} : memref<196x128xf32, #tpu.memory_space<vmem>>, vector<4x128xf32>,
    %c0_119 = arith.constant 0 : index
    %c0_120 = arith.constant 0 : index
    %c8_121 = arith.constant 8 : index
    %c18_122 = arith.constant 18 : index
    %75 = vector.load %arg2[%c0_119, %c0_120, %c8_121, %c18_122] : memref<1x1x16x192xf32, #tpu.memory_space<vmem>>, vector<1x1x4x128xf32>
    %76 = vector.shape_cast %75 : vector<1x1x4x128xf32> to vector<4x128xf32>
    %c100 = arith.constant 100 : index
    %c0_123 = arith.constant 0 : index
    %77 = vector.load %arg6[%c100, %c0_123] : memref<196x128xf32, #tpu.memory_space<vmem>>, vector<4x128xf32>
    tpu.vector_store %arg6[%c100, %c0_123], %76 {strides = array<i32>} : memref<196x128xf32, #tpu.memory_space<vmem>>, vector<4x128xf32>,
    %c0_124 = arith.constant 0 : index
    %c0_125 = arith.constant 0 : index
    %c12_126 = arith.constant 12 : index
    %c18_127 = arith.constant 18 : index
    %78 = vector.load %arg2[%c0_124, %c0_125, %c12_126, %c18_127] : memref<1x1x16x192xf32, #tpu.memory_space<vmem>>, vector<1x1x4x128xf32>
    %79 = vector.shape_cast %78 : vector<1x1x4x128xf32> to vector<4x128xf32>
    %c104 = arith.constant 104 : index
    %c0_128 = arith.constant 0 : index
    %80 = vector.load %arg6[%c104, %c0_128] : memref<196x128xf32, #tpu.memory_space<vmem>>, vector<4x128xf32>
    tpu.vector_store %arg6[%c104, %c0_128], %79 {strides = array<i32>} : memref<196x128xf32, #tpu.memory_space<vmem>>, vector<4x128xf32>,
    %c0_129 = arith.constant 0 : index
    %c0_130 = arith.constant 0 : index
    %c8_131 = arith.constant 8 : index
    %c19_132 = arith.constant 19 : index
    %81 = vector.load %arg2[%c0_129, %c0_130, %c8_131, %c19_132] : memref<1x1x16x192xf32, #tpu.memory_space<vmem>>, vector<1x1x4x128xf32>
    %82 = vector.shape_cast %81 : vector<1x1x4x128xf32> to vector<4x128xf32>
    %c108 = arith.constant 108 : index
    %c0_133 = arith.constant 0 : index
    %83 = vector.load %arg6[%c108, %c0_133] : memref<196x128xf32, #tpu.memory_space<vmem>>, vector<4x128xf32>
    tpu.vector_store %arg6[%c108, %c0_133], %82 {strides = array<i32>} : memref<196x128xf32, #tpu.memory_space<vmem>>, vector<4x128xf32>,
    %c0_134 = arith.constant 0 : index
    %c0_135 = arith.constant 0 : index
    %c0_136 = arith.constant 0 : index
    %c32_137 = arith.constant 32 : index
    %84 = vector.load %arg2[%c0_134, %c0_135, %c0_136, %c32_137] : memref<1x1x16x192xf32, #tpu.memory_space<vmem>>, vector<1x1x4x128xf32>
    %85 = vector.shape_cast %84 : vector<1x1x4x128xf32> to vector<4x128xf32>
    %c112 = arith.constant 112 : index
    %c0_138 = arith.constant 0 : index
    %86 = vector.load %arg6[%c112, %c0_138] : memref<196x128xf32, #tpu.memory_space<vmem>>, vector<4x128xf32>
    tpu.vector_store %arg6[%c112, %c0_138], %85 {strides = array<i32>} : memref<196x128xf32, #tpu.memory_space<vmem>>, vector<4x128xf32>,
    %c0_139 = arith.constant 0 : index
    %c0_140 = arith.constant 0 : index
    %c4_141 = arith.constant 4 : index
    %c32_142 = arith.constant 32 : index
    %87 = vector.load %arg2[%c0_139, %c0_140, %c4_141, %c32_142] : memref<1x1x16x192xf32, #tpu.memory_space<vmem>>, vector<1x1x4x128xf32>
    %88 = vector.shape_cast %87 : vector<1x1x4x128xf32> to vector<4x128xf32>
    %c116 = arith.constant 116 : index
    %c0_143 = arith.constant 0 : index
    %89 = vector.load %arg6[%c116, %c0_143] : memref<196x128xf32, #tpu.memory_space<vmem>>, vector<4x128xf32>
    tpu.vector_store %arg6[%c116, %c0_143], %88 {strides = array<i32>} : memref<196x128xf32, #tpu.memory_space<vmem>>, vector<4x128xf32>,
    %c0_144 = arith.constant 0 : index
    %c0_145 = arith.constant 0 : index
    %c0_146 = arith.constant 0 : index
    %c33 = arith.constant 33 : index
    %90 = vector.load %arg2[%c0_144, %c0_145, %c0_146, %c33] : memref<1x1x16x192xf32, #tpu.memory_space<vmem>>, vector<1x1x4x128xf32>
    %91 = vector.shape_cast %90 : vector<1x1x4x128xf32> to vector<4x128xf32>
    %c120 = arith.constant 120 : index
    %c0_147 = arith.constant 0 : index
    %92 = vector.load %arg6[%c120, %c0_147] : memref<196x128xf32, #tpu.memory_space<vmem>>, vector<4x128xf32>
    tpu.vector_store %arg6[%c120, %c0_147], %91 {strides = array<i32>} : memref<196x128xf32, #tpu.memory_space<vmem>>, vector<4x128xf32>,
    %c0_148 = arith.constant 0 : index
    %c0_149 = arith.constant 0 : index
    %c4_150 = arith.constant 4 : index
    %c33_151 = arith.constant 33 : index
    %93 = vector.load %arg2[%c0_148, %c0_149, %c4_150, %c33_151] : memref<1x1x16x192xf32, #tpu.memory_space<vmem>>, vector<1x1x4x128xf32>
    %94 = vector.shape_cast %93 : vector<1x1x4x128xf32> to vector<4x128xf32>
    %c124 = arith.constant 124 : index
    %c0_152 = arith.constant 0 : index
    %95 = vector.load %arg6[%c124, %c0_152] : memref<196x128xf32, #tpu.memory_space<vmem>>, vector<4x128xf32>
    tpu.vector_store %arg6[%c124, %c0_152], %94 {strides = array<i32>} : memref<196x128xf32, #tpu.memory_space<vmem>>, vector<4x128xf32>,
    %c0_153 = arith.constant 0 : index
    %c0_154 = arith.constant 0 : index
    %c0_155 = arith.constant 0 : index
    %c34 = arith.constant 34 : index
    %96 = vector.load %arg2[%c0_153, %c0_154, %c0_155, %c34] : memref<1x1x16x192xf32, #tpu.memory_space<vmem>>, vector<1x1x4x128xf32>
    %97 = vector.shape_cast %96 : vector<1x1x4x128xf32> to vector<4x128xf32>
    %c128 = arith.constant 128 : index
    %c0_156 = arith.constant 0 : index
    %98 = vector.load %arg6[%c128, %c0_156] : memref<196x128xf32, #tpu.memory_space<vmem>>, vector<4x128xf32>
    tpu.vector_store %arg6[%c128, %c0_156], %97 {strides = array<i32>} : memref<196x128xf32, #tpu.memory_space<vmem>>, vector<4x128xf32>,
    %c0_157 = arith.constant 0 : index
    %c0_158 = arith.constant 0 : index
    %c4_159 = arith.constant 4 : index
    %c34_160 = arith.constant 34 : index
    %99 = vector.load %arg2[%c0_157, %c0_158, %c4_159, %c34_160] : memref<1x1x16x192xf32, #tpu.memory_space<vmem>>, vector<1x1x4x128xf32>
    %100 = vector.shape_cast %99 : vector<1x1x4x128xf32> to vector<4x128xf32>
    %c132 = arith.constant 132 : index
    %c0_161 = arith.constant 0 : index
    %101 = vector.load %arg6[%c132, %c0_161] : memref<196x128xf32, #tpu.memory_space<vmem>>, vector<4x128xf32>
    tpu.vector_store %arg6[%c132, %c0_161], %100 {strides = array<i32>} : memref<196x128xf32, #tpu.memory_space<vmem>>, vector<4x128xf32>,
    %c0_162 = arith.constant 0 : index
    %c0_163 = arith.constant 0 : index
    %c0_164 = arith.constant 0 : index
    %c35 = arith.constant 35 : index
    %102 = vector.load %arg2[%c0_162, %c0_163, %c0_164, %c35] : memref<1x1x16x192xf32, #tpu.memory_space<vmem>>, vector<1x1x4x128xf32>
    %103 = vector.shape_cast %102 : vector<1x1x4x128xf32> to vector<4x128xf32>
    %c136 = arith.constant 136 : index
    %c0_165 = arith.constant 0 : index
    %104 = vector.load %arg6[%c136, %c0_165] : memref<196x128xf32, #tpu.memory_space<vmem>>, vector<4x128xf32>
    tpu.vector_store %arg6[%c136, %c0_165], %103 {strides = array<i32>} : memref<196x128xf32, #tpu.memory_space<vmem>>, vector<4x128xf32>,
    %c0_166 = arith.constant 0 : index
    %c0_167 = arith.constant 0 : index
    %c8_168 = arith.constant 8 : index
    %c32_169 = arith.constant 32 : index
    %105 = vector.load %arg2[%c0_166, %c0_167, %c8_168, %c32_169] : memref<1x1x16x192xf32, #tpu.memory_space<vmem>>, vector<1x1x4x128xf32>
    %106 = vector.shape_cast %105 : vector<1x1x4x128xf32> to vector<4x128xf32>
    %c140 = arith.constant 140 : index
    %c0_170 = arith.constant 0 : index
    %107 = vector.load %arg6[%c140, %c0_170] : memref<196x128xf32, #tpu.memory_space<vmem>>, vector<4x128xf32>
    tpu.vector_store %arg6[%c140, %c0_170], %106 {strides = array<i32>} : memref<196x128xf32, #tpu.memory_space<vmem>>, vector<4x128xf32>,
    %c0_171 = arith.constant 0 : index
    %c0_172 = arith.constant 0 : index
    %c12_173 = arith.constant 12 : index
    %c32_174 = arith.constant 32 : index
    %108 = vector.load %arg2[%c0_171, %c0_172, %c12_173, %c32_174] : memref<1x1x16x192xf32, #tpu.memory_space<vmem>>, vector<1x1x4x128xf32>
    %109 = vector.shape_cast %108 : vector<1x1x4x128xf32> to vector<4x128xf32>
    %c144 = arith.constant 144 : index
    %c0_175 = arith.constant 0 : index
    %110 = vector.load %arg6[%c144, %c0_175] : memref<196x128xf32, #tpu.memory_space<vmem>>, vector<4x128xf32>
    tpu.vector_store %arg6[%c144, %c0_175], %109 {strides = array<i32>} : memref<196x128xf32, #tpu.memory_space<vmem>>, vector<4x128xf32>,
    %c0_176 = arith.constant 0 : index
    %c0_177 = arith.constant 0 : index
    %c8_178 = arith.constant 8 : index
    %c33_179 = arith.constant 33 : index
    %111 = vector.load %arg2[%c0_176, %c0_177, %c8_178, %c33_179] : memref<1x1x16x192xf32, #tpu.memory_space<vmem>>, vector<1x1x4x128xf32>
    %112 = vector.shape_cast %111 : vector<1x1x4x128xf32> to vector<4x128xf32>
    %c148 = arith.constant 148 : index
    %c0_180 = arith.constant 0 : index
    %113 = vector.load %arg6[%c148, %c0_180] : memref<196x128xf32, #tpu.memory_space<vmem>>, vector<4x128xf32>
    tpu.vector_store %arg6[%c148, %c0_180], %112 {strides = array<i32>} : memref<196x128xf32, #tpu.memory_space<vmem>>, vector<4x128xf32>,
    %c0_181 = arith.constant 0 : index
    %c0_182 = arith.constant 0 : index
    %c12_183 = arith.constant 12 : index
    %c33_184 = arith.constant 33 : index
    %114 = vector.load %arg2[%c0_181, %c0_182, %c12_183, %c33_184] : memref<1x1x16x192xf32, #tpu.memory_space<vmem>>, vector<1x1x4x128xf32>
    %115 = vector.shape_cast %114 : vector<1x1x4x128xf32> to vector<4x128xf32>
    %c152 = arith.constant 152 : index
    %c0_185 = arith.constant 0 : index
    %116 = vector.load %arg6[%c152, %c0_185] : memref<196x128xf32, #tpu.memory_space<vmem>>, vector<4x128xf32>
    tpu.vector_store %arg6[%c152, %c0_185], %115 {strides = array<i32>} : memref<196x128xf32, #tpu.memory_space<vmem>>, vector<4x128xf32>,
    %c0_186 = arith.constant 0 : index
    %c0_187 = arith.constant 0 : index
    %c8_188 = arith.constant 8 : index
    %c34_189 = arith.constant 34 : index
    %117 = vector.load %arg2[%c0_186, %c0_187, %c8_188, %c34_189] : memref<1x1x16x192xf32, #tpu.memory_space<vmem>>, vector<1x1x4x128xf32>
    %118 = vector.shape_cast %117 : vector<1x1x4x128xf32> to vector<4x128xf32>
    %c156 = arith.constant 156 : index
    %c0_190 = arith.constant 0 : index
    %119 = vector.load %arg6[%c156, %c0_190] : memref<196x128xf32, #tpu.memory_space<vmem>>, vector<4x128xf32>
    tpu.vector_store %arg6[%c156, %c0_190], %118 {strides = array<i32>} : memref<196x128xf32, #tpu.memory_space<vmem>>, vector<4x128xf32>,
    %c0_191 = arith.constant 0 : index
    %c0_192 = arith.constant 0 : index
    %c12_193 = arith.constant 12 : index
    %c34_194 = arith.constant 34 : index
    %120 = vector.load %arg2[%c0_191, %c0_192, %c12_193, %c34_194] : memref<1x1x16x192xf32, #tpu.memory_space<vmem>>, vector<1x1x4x128xf32>
    %121 = vector.shape_cast %120 : vector<1x1x4x128xf32> to vector<4x128xf32>
    %c160 = arith.constant 160 : index
    %c0_195 = arith.constant 0 : index
    %122 = vector.load %arg6[%c160, %c0_195] : memref<196x128xf32, #tpu.memory_space<vmem>>, vector<4x128xf32>
    tpu.vector_store %arg6[%c160, %c0_195], %121 {strides = array<i32>} : memref<196x128xf32, #tpu.memory_space<vmem>>, vector<4x128xf32>,
    %c0_196 = arith.constant 0 : index
    %c0_197 = arith.constant 0 : index
    %c8_198 = arith.constant 8 : index
    %c35_199 = arith.constant 35 : index
    %123 = vector.load %arg2[%c0_196, %c0_197, %c8_198, %c35_199] : memref<1x1x16x192xf32, #tpu.memory_space<vmem>>, vector<1x1x4x128xf32>
    %124 = vector.shape_cast %123 : vector<1x1x4x128xf32> to vector<4x128xf32>
    %c164 = arith.constant 164 : index
    %c0_200 = arith.constant 0 : index
    %125 = vector.load %arg6[%c164, %c0_200] : memref<196x128xf32, #tpu.memory_space<vmem>>, vector<4x128xf32>
    tpu.vector_store %arg6[%c164, %c0_200], %124 {strides = array<i32>} : memref<196x128xf32, #tpu.memory_space<vmem>>, vector<4x128xf32>,
    %c0_201 = arith.constant 0 : index
    %c0_202 = arith.constant 0 : index
    %c0_203 = arith.constant 0 : index
    %c48_204 = arith.constant 48 : index
    %126 = vector.load %arg2[%c0_201, %c0_202, %c0_203, %c48_204] : memref<1x1x16x192xf32, #tpu.memory_space<vmem>>, vector<1x1x4x128xf32>
    %127 = vector.shape_cast %126 : vector<1x1x4x128xf32> to vector<4x128xf32>
    %c168 = arith.constant 168 : index
    %c0_205 = arith.constant 0 : index
    %128 = vector.load %arg6[%c168, %c0_205] : memref<196x128xf32, #tpu.memory_space<vmem>>, vector<4x128xf32>
    tpu.vector_store %arg6[%c168, %c0_205], %127 {strides = array<i32>} : memref<196x128xf32, #tpu.memory_space<vmem>>, vector<4x128xf32>,
    %c0_206 = arith.constant 0 : index
    %c0_207 = arith.constant 0 : index
    %c4_208 = arith.constant 4 : index
    %c48_209 = arith.constant 48 : index
    %129 = vector.load %arg2[%c0_206, %c0_207, %c4_208, %c48_209] : memref<1x1x16x192xf32, #tpu.memory_space<vmem>>, vector<1x1x4x128xf32>
    %130 = vector.shape_cast %129 : vector<1x1x4x128xf32> to vector<4x128xf32>
    %c172 = arith.constant 172 : index
    %c0_210 = arith.constant 0 : index
    %131 = vector.load %arg6[%c172, %c0_210] : memref<196x128xf32, #tpu.memory_space<vmem>>, vector<4x128xf32>
    tpu.vector_store %arg6[%c172, %c0_210], %130 {strides = array<i32>} : memref<196x128xf32, #tpu.memory_space<vmem>>, vector<4x128xf32>,
    %c0_211 = arith.constant 0 : index
    %c0_212 = arith.constant 0 : index
    %c0_213 = arith.constant 0 : index
    %c49 = arith.constant 49 : index
    %132 = vector.load %arg2[%c0_211, %c0_212, %c0_213, %c49] : memref<1x1x16x192xf32, #tpu.memory_space<vmem>>, vector<1x1x4x128xf32>
    %133 = vector.shape_cast %132 : vector<1x1x4x128xf32> to vector<4x128xf32>
    %c176 = arith.constant 176 : index
    %c0_214 = arith.constant 0 : index
    %134 = vector.load %arg6[%c176, %c0_214] : memref<196x128xf32, #tpu.memory_space<vmem>>, vector<4x128xf32>
    tpu.vector_store %arg6[%c176, %c0_214], %133 {strides = array<i32>} : memref<196x128xf32, #tpu.memory_space<vmem>>, vector<4x128xf32>,
    %c0_215 = arith.constant 0 : index
    %c0_216 = arith.constant 0 : index
    %c4_217 = arith.constant 4 : index
    %c49_218 = arith.constant 49 : index
    %135 = vector.load %arg2[%c0_215, %c0_216, %c4_217, %c49_218] : memref<1x1x16x192xf32, #tpu.memory_space<vmem>>, vector<1x1x4x128xf32>
    %136 = vector.shape_cast %135 : vector<1x1x4x128xf32> to vector<4x128xf32>
    %c180 = arith.constant 180 : index
    %c0_219 = arith.constant 0 : index
    %137 = vector.load %arg6[%c180, %c0_219] : memref<196x128xf32, #tpu.memory_space<vmem>>, vector<4x128xf32>
    tpu.vector_store %arg6[%c180, %c0_219], %136 {strides = array<i32>} : memref<196x128xf32, #tpu.memory_space<vmem>>, vector<4x128xf32>,
    %c0_220 = arith.constant 0 : index
    %c0_221 = arith.constant 0 : index
    %c0_222 = arith.constant 0 : index
    %c50 = arith.constant 50 : index
    %138 = vector.load %arg2[%c0_220, %c0_221, %c0_222, %c50] : memref<1x1x16x192xf32, #tpu.memory_space<vmem>>, vector<1x1x4x128xf32>
    %139 = vector.shape_cast %138 : vector<1x1x4x128xf32> to vector<4x128xf32>
    %c184 = arith.constant 184 : index
    %c0_223 = arith.constant 0 : index
    %140 = vector.load %arg6[%c184, %c0_223] : memref<196x128xf32, #tpu.memory_space<vmem>>, vector<4x128xf32>
    tpu.vector_store %arg6[%c184, %c0_223], %139 {strides = array<i32>} : memref<196x128xf32, #tpu.memory_space<vmem>>, vector<4x128xf32>,
    %c0_224 = arith.constant 0 : index
    %c0_225 = arith.constant 0 : index
    %c4_226 = arith.constant 4 : index
    %c50_227 = arith.constant 50 : index
    %141 = vector.load %arg2[%c0_224, %c0_225, %c4_226, %c50_227] : memref<1x1x16x192xf32, #tpu.memory_space<vmem>>, vector<1x1x4x128xf32>
    %142 = vector.shape_cast %141 : vector<1x1x4x128xf32> to vector<4x128xf32>
    %c188 = arith.constant 188 : index
    %c0_228 = arith.constant 0 : index
    %143 = vector.load %arg6[%c188, %c0_228] : memref<196x128xf32, #tpu.memory_space<vmem>>, vector<4x128xf32>
    tpu.vector_store %arg6[%c188, %c0_228], %142 {strides = array<i32>} : memref<196x128xf32, #tpu.memory_space<vmem>>, vector<4x128xf32>,
    %c0_229 = arith.constant 0 : index
    %c0_230 = arith.constant 0 : index
    %c0_231 = arith.constant 0 : index
    %c51 = arith.constant 51 : index
    %144 = vector.load %arg2[%c0_229, %c0_230, %c0_231, %c51] : memref<1x1x16x192xf32, #tpu.memory_space<vmem>>, vector<1x1x4x128xf32>
    %145 = vector.shape_cast %144 : vector<1x1x4x128xf32> to vector<4x128xf32>
    %c192 = arith.constant 192 : index
    %c0_232 = arith.constant 0 : index
    %146 = vector.load %arg6[%c192, %c0_232] : memref<196x128xf32, #tpu.memory_space<vmem>>, vector<4x128xf32>
    tpu.vector_store %arg6[%c192, %c0_232], %145 {strides = array<i32>} : memref<196x128xf32, #tpu.memory_space<vmem>>, vector<4x128xf32>,
    %c0_233 = arith.constant 0 : index
    %c0_234 = arith.constant 0 : index
    %147 = vector.load %arg3[%c0_233, %c0_234] : memref<16x196xf32, #tpu.memory_space<vmem>>, vector<16x196xf32>
    %c0_235 = arith.constant 0 : index
    %c0_236 = arith.constant 0 : index
    %148 = vector.load %arg6[%c0_235, %c0_236] : memref<196x128xf32, #tpu.memory_space<vmem>>, vector<196x128xf32>
    %cst = arith.constant dense<0.000000e+00> : vector<16x128xf32>
    %149 = tpu.matmul %147, %148, %cst {dimension_numbers = #tpu.dot_dimension_numbers<[1], [0], [0], [1], [0, 0, 1, 1], [], []>} : vector<16x196xf32>, vector<196x128xf32>, vector<16x128xf32> -> vector<16x128xf32>
    %c0_237 = arith.constant 0 : index
    %c0_238 = arith.constant 0 : index
    %150 = vector.load %arg4[%c0_237, %c0_238] : memref<16x1xf32, #tpu.memory_space<vmem>>, vector<16x1xf32>
    %151 = vector.broadcast %150 : vector<16x1xf32> to vector<16x128xf32>
    %152 = arith.addf %149, %151 : vector<16x128xf32>
    %c0_239 = arith.constant 0 : index
    %c0_240 = arith.constant 0 : index
    %c0_241 = arith.constant 0 : index
    %153 = vector.load %arg5[%c0_239, %c0_240, %c0_241] : memref<1x16x128xf32, #tpu.memory_space<vmem>>, vector<1x16x128xf32>
    %154 = vector.shape_cast %153 : vector<1x16x128xf32> to vector<16x128xf32>
    %155 = vector.shape_cast %152 : vector<16x128xf32> to vector<1x16x128xf32>
    tpu.vector_store %arg5[%c0_239, %c0_240, %c0_241], %155 {strides = array<i32>} : memref<1x16x128xf32, #tpu.memory_space<vmem>>, vector<1x16x128xf32>,
    return
  }
  func.func @transform_0(%arg0: i32, %arg1: i32) -> (i32, i32, i32, i32) {
    %c0_i32 = arith.constant 0 : i32
    %c0_i32_0 = arith.constant 0 : i32
    %c0_i32_1 = arith.constant 0 : i32
    return %arg0, %arg1, %c0_i32, %c0_i32_0 : i32, i32, i32, i32
  }
  func.func @transform_1(%arg0: i32, %arg1: i32) -> (i32, i32) {
    %c0_i32 = arith.constant 0 : i32
    %c0_i32_0 = arith.constant 0 : i32
    %c0_i32_1 = arith.constant 0 : i32
    return %c0_i32, %c0_i32_0 : i32, i32
  }
  func.func @transform_2(%arg0: i32, %arg1: i32) -> (i32, i32) {
    %c0_i32 = arith.constant 0 : i32
    %c0_i32_0 = arith.constant 0 : i32
    %c0_i32_1 = arith.constant 0 : i32
    return %c0_i32, %c0_i32_0 : i32, i32
  }
  func.func @transform_3(%arg0: i32, %arg1: i32) -> (i32, i32, i32) {
    %c0_i32 = arith.constant 0 : i32
    %c0_i32_0 = arith.constant 0 : i32
    return %arg0, %c0_i32, %arg1 : i32, i32, i32
  }
}

</mosaic_0001>

<bundles_post_ra>
// kernel: tpu_custom_call.1
= control target key start
LH: loop header
LB: loop body
LE: loop exit
PB: predicated region body
PF: predicated region fallthrough
CT: control target
= control target key end

     0   :  { %s1639_s0 = inlined_call_operand.hbm [shape: f32[2,1,16,192], index: 0, kind: input, shape index: {}]   ;;  %s1640_s1 = inlined_call_operand.hbm [shape: f32[16,196], index: 1, kind: input, shape index: {}]   ;;  %s1641_s2 = inlined_call_operand.vmem [shape: f32[16,1], index: 2, kind: input, shape index: {}]   ;;  %s1642_s3 = inlined_call_operand.hbm [shape: f32[2,16,128], index: 3, kind: output, shape index: {}]  }
   0x1   :  { %1644 = sst [smem:[#allocation12_spill]] %s1640_s1 }
   0x2   :  { %8 = vsyncpa [#allocation4], 0 }
   0x3   :  { %10 = vsyncpa [#allocation4 + $0x1], 0 }
   0x4   :  { %11 = vsyncpa [#allocation7], 0 }
   0x5   :  { %12 = vsyncpa [#allocation5], 0 }
   0x6   :  { %14 = vsyncpa [#allocation5 + $0x1], 0  ;;  %s1279_s12 = smov 0   ;;  %s1281_s13 = smov 0  }
   0x7   :  { %s1283_s14 = smov 0   ;;  %s1285_s15 = smov 0  }
   0x8   :  { %s1287_s16 = smov 0   ;;  %s1289_s17 = smov 0  }
   0x9 LB: > { %s957_s18 = sadd.s32 4294967295, %s1236_s17   ;;  %s958_s19 = sadd.s32 4294967294, %s1236_s17   ;;  %s1236_s17 = sphi %s1289_s17, %s20_s17   ;;  %s1232_s16 = sphi %s1287_s16, %s1658_s16   ;;  %s1228_s15 = sphi %s1285_s15, %s1657_s15   ;;  %s1224_s14 = sphi %s1283_s14, %s1656_s14   ;;  %s1220_s13 = sphi %s1281_s13, %s1655_s13   ;;  %s1216_s12 = sphi %s1279_s12, %s1654_s12  }
   0xa   : > { %p54_p0 = scmp.ne.s32.totalorder %s1220_s13, %s1216_s12  ;;  %p1313_p1 = scmp.eq.s32.totalorder %s957_s18, 0 }
   0xb   : > { %p1317_p2 = scmp.eq.s32.totalorder %s957_s18, 1  ;;  %p128_p3 = scmp.eq.s32.totalorder %s958_s19, 1 }
   0xc   : > { %p1323_p4 = por %p1313_p1, %p54_p0  ;;  %p959_p5 = scmp.ge.s32.totalorder %s1236_s17, 1 }
   0xd   : > { %p1328_p6 = por %p128_p3, %p54_p0  ;;  %p135_p7 = scmp.lt.s32.totalorder %s1236_s17, 3 }
   0xe   : > { %s1649_s1 = sld [smem:[#allocation12_spill]]  ;;  %s1238_s28 = smov [#allocation6]  }
   0xf   : > { %p1336_p8 = pnand %p959_p5, %p135_p7  ;;  %s148_s29 = sshll.u32 %s1238_s28, 4  ;;  %s149_s29 = int_to_ptr.vmem [resolvable:$true] %s148_s29 }
  0x10   : > { %p961_p11 = scmp.ge.s32.totalorder %s1236_s17, 2  ;;  %s1643_s30 = smov 256  }
  0x11   : > { %p1003_p9 = pneg %p1336_p8  ;;  %s1240_s4 = smov 16  }
  0x12   : > { %s32_s5 = sadd.s32 1, %s1232_s16  ;;  %s41_s6 = sadd.s32 1, %s1224_s14 }
  0x13   : > { %p1004_p10 = pnand %p1003_p9, %p1313_p1  ;;  %p34_p12 = scmp.ge.s32.totalorder %s32_s5, 2 }
  0x14   : > { %s146_s26 = sshll.u32 %s1649_s1, 4  ;;  %p48_p13 = scmp.ne.s32.totalorder %s1224_s14, %s1220_s13  ;;  %s147_s26 = int_to_ptr.hbm [resolvable:$true] %s146_s26 }
  0x15   : > { %1006 = dma.hbm_to_vmem [thread:$0]  (!%p1004_p10), %s147_s26, 512, %s149_s29, [#allocation7], %s1643_s30, %s1643_s30, %s1240_s4  }
  0x16   : > { %p49_p0 = scmp.eq.s32.totalorder %s1236_s17, 0  ;;  %s1660_s5 = smov (%p34_p12, %s32_s5), 0 }
  0x17   : > { %p1361_p5 = por %p1317_p2, %p48_p13  ;;  %s36_s9 = ssub.s32 %s1232_s16, %s1660_s5 }
  0x18   : > { %p1355_p3 = por %p49_p0, %p48_p13  ;;  %p1016_p7 = scmp.lt.s32.totalorder %s1236_s17, 2 }
  0x19   : > { %p39_p9 = scmp.eq.s32.totalorder %s36_s9, 0  ;;  %s165_s10 = sand.u32 1, %s1224_s14  }
  0x1a   : > { %s962_s11 = sshll.u32 %s165_s10, 5  ;;  %s977_s19 = sshll.u32 %s1232_s16, 5 }
  0x1b   : > { %s1370_s18 = scalar_select %p39_p9, %s1224_s14, %s41_s6  }
  0x1c   : > { %s176_s26 = scalar_lea.hbm %s1639_s0, %s977_s19  ;;  %s169_s28 = scalar_lea.vmem [#allocation3], %s962_s11 }
  0x1d   : > { %s179_s29 = sshll.u32 %s169_s28, 4  ;;  %s177_s21 = sshll.u32 %s176_s26, 4  ;;  %s180_s29 = int_to_ptr.vmem [resolvable:$true] %s179_s29  ;;  %s178_s21 = int_to_ptr.hbm [resolvable:$true] %s177_s21 }
  0x1e   : > { %p1008_p2 = pnand %p1016_p7, %p1355_p3  ;;  %s166_s30 = scalar_lea.sflag [#allocation4], %s165_s10 }
  0x1f   : > { %s1653_s1 = smov 256   ;;  %191 = sbr.rel (%p1336_p8) target bundleno = 539 (0x21b), region = 32 }
  0x20   : > { %1010 = dma.hbm_to_vmem [thread:$0]  (!%p1008_p2), %s178_s21, 512, %s180_s29, %s166_s30, %s1653_s1, %s1653_s1, %s1240_s4  }
  0x21   : > { %s1384_s6 = sand.u32 (!%p1336_p8), 1, %s1220_s13  }
  0x22   : > { %s966_s9 = sshll.u32 (!%p1336_p8), %s1384_s6, 5  ;;  %s194_s11 = scalar_lea.sflag (!%p1336_p8), [#allocation4], %s1384_s6 }
  0x23   : > { %s1388_s19 = scalar_lea.vmem (!%p1336_p8), [#allocation3], %s966_s9 }
  0x24   : > { %1203 = dma.done.wait (%p1323_p4), %s194_s11, 512  }
  0x25   : > { %1205 = vsyncadd (%p1323_p4), %s194_s11, 4294966784 }
  0x26   : > { %1207 = dma.done.wait (%p1313_p1), [#allocation7], 512  }
  0x27   : > { %1209 = vsyncadd (%p1313_p1), [#allocation7], 4294966784  ;;  %v242_v0 = vld [vmem:[%s1388_s19] sm:$0xf0]  ;;  %v230_v1 = vld [vmem:[%s1388_s19] sm:$0xf] }
  0x28   : > { %s1241_s1 = smov 127   ;;  %v253_v2 = vld [vmem:[%s1388_s19] sm:$0xf]  ;;  %s1242_s22 = smov 126   ;;  %v243_v3 = vld [vmem:[%s1388_s19 + $0x8] sm:$0xf0] }
  0x29   : > { %246 = vrot.lane.b32.xlu1 %v242_v0, %s1241_s1  ;;  %234 = vrot.lane.b32.xlu0 %v230_v1, %s1241_s1  ;;  %v231_v4 = vld [vmem:[%s1388_s19 + $0x8] sm:$0xf]  ;;  %v266_v6 = vld [vmem:[%s1388_s19 + $0x8] sm:$0xf0]  ;;  %s1243_s20 = smov 125   ;;  %s1244_s27 = smov 112  }
  0x2a   : > { %257 = vrot.lane.b32.xlu2 %v253_v2, %s1242_s22  ;;  %v254_v5 = vld [vmem:[%s1388_s19 + $0x8] sm:$0xf]  ;;  %v265_v7 = vld [vmem:[%s1388_s19] sm:$0xf0]  ;;  %v276_v8 = vld [vmem:[%s1388_s19] sm:$0xf] }
  0x2b   : > { %v292_v9 = vld [vmem:[%s1388_s19 + $0x10] sm:$0xf]  ;;  %v277_v10 = vld [vmem:[%s1388_s19 + $0x8] sm:$0xf]  ;;  %v293_v11 = vld [vmem:[%s1388_s19 + $0x18] sm:$0xf] }
  0x2c   : > { %v304_v12 = vld [vmem:[%s1388_s19 + $0x18] sm:$0xf0]  ;;  %v303_v13 = vld [vmem:[%s1388_s19 + $0x10] sm:$0xf0]  ;;  %v314_v14 = vld [vmem:[%s1388_s19 + $0x10] sm:$0xf] }
  0x2d   : > { %v325_v15 = vld [vmem:[%s1388_s19 + $0x10] sm:$0xf0]  ;;  %v315_v16 = vld [vmem:[%s1388_s19 + $0x18] sm:$0xf]  ;;  %v326_v17 = vld [vmem:[%s1388_s19 + $0x18] sm:$0xf0] }
  0x2e   : > { %v337_v18 = vld [vmem:[%s1388_s19 + $0x18] sm:$0xf]  ;;  %v336_v19 = vld [vmem:[%s1388_s19 + $0x10] sm:$0xf]  ;;  %v347_v20 = vld [vmem:[%s1388_s19] sm:$0xf] }
  0x2f   : > { %v528_v21 = vld [vmem:[%s1388_s19] sm:$0xf]  ;;  %v348_v22 = vld [vmem:[%s1388_s19 + $0x8] sm:$0xf]  ;;  %s1245_s30 = smov 95   ;;  %s1246_s4 = smov 96  }
  0x30   : > { %v529_v23 = vld [vmem:[%s1388_s19 + $0x8] sm:$0xf]  ;;  %v541_v24 = vld [vmem:[%s1388_s19 + $0x8] sm:$0xf0]  ;;  %v540_v25 = vld [vmem:[%s1388_s19] sm:$0xf0] }
  0x31   : > { %248 = vrot.lane.b32.xlu1 %v243_v3, %s1241_s1  ;;  %236 = vrot.lane.b32.xlu0 %v231_v4, %s1241_s1  ;;  %v505_v26 = vld [vmem:[%s1388_s19] sm:$0xf]  ;;  %v517_v27 = vld [vmem:[%s1388_s19] sm:$0xf0]  ;;  %s1247_s7 = smov 110   ;;  %s1248_s10 = smov 109  }
  0x32   : > { %259 = vrot.lane.b32.xlu2 %v254_v5, %s1242_s22  ;;  %v506_v28 = vld [vmem:[%s1388_s19 + $0x8] sm:$0xf]  ;;  %v518_v29 = vld [vmem:[%s1388_s19 + $0x8] sm:$0xf0]  ;;  %v484_v30 = vld [vmem:[%s1388_s19 + $0x18] sm:$0xf0] }
  0x33   : > { %v483_v31 = vld [vmem:[%s1388_s19 + $0x10] sm:$0xf0]  ;;  %v494_v32 = vld [vmem:[%s1388_s19 + $0x10] sm:$0xf]  ;;  %v495_v34 = vld [vmem:[%s1388_s19 + $0x18] sm:$0xf] }
  0x34   : > { %v461_v33 = vld [vmem:[%s1388_s19 + $0x10] sm:$0xf0]  ;;  %v462_v35 = vld [vmem:[%s1388_s19 + $0x18] sm:$0xf0]  ;;  %s1249_s24 = smov 111   ;;  %vm261_vm0 = vcmask 1031168  }
  0x35   : > { %v473_v37 = vld [vmem:[%s1388_s19 + $0x18] sm:$0xf]  ;;  %v472_v38 = vld [vmem:[%s1388_s19 + $0x10] sm:$0xf]  ;;  %v439_v39 = vld [vmem:[%s1388_s19 + $0x10] sm:$0xf0] }
  0x36   : > { %v450_v42 = vld [vmem:[%s1388_s19 + $0x10] sm:$0xf]  ;;  %v440_v43 = vld [vmem:[%s1388_s19 + $0x18] sm:$0xf0]  ;;  %v451_v44 = vld [vmem:[%s1388_s19 + $0x18] sm:$0xf] }
  0x37   : > { %v290_v46 = vld [vmem:[%s1388_s19 + $0x10] sm:$0xf0]  ;;  %v288_v47 = vld [vmem:[%s1388_s19 + $0x10] sm:$0xf]  ;;  %v417_v48 = vld [vmem:[%s1388_s19 + $0x8] sm:$0xf] }
  0x38   : > { %v416_v49 = vld [vmem:[%s1388_s19] sm:$0xf]  ;;  %291 = vst [vmem:[#allocation2 + $0x1c] sm:$0xf0] %v290_v46  ;;  %v428_v50 = vld [vmem:[%s1388_s19 + $0x10] sm:$0xf] }
  0x39   : > { %271 = vrot.lane.b32.xlu1 %v266_v6, %s1242_s22  ;;  %269 = vrot.lane.b32.xlu0 %v265_v7, %s1242_s22  ;;  %289 = vst [vmem:[#allocation2 + $0x1c] sm:$0xf] %v288_v47  ;;  %v393_v54 = vld [vmem:[%s1388_s19] sm:$0xf]  ;;  %v429_v55 = vld [vmem:[%s1388_s19 + $0x18] sm:$0xf] }
  0x3a   : > { %280 = vrot.lane.b32.xlu2 %v276_v8, %s1243_s20  ;;  %v394_v56 = vld [vmem:[%s1388_s19 + $0x8] sm:$0xf]  ;;  %vm238_vm1 = vcmask 1039360   ;;  %v406_v62 = vld [vmem:[%s1388_s19 + $0x8] sm:$0xf0]  ;;  %vm284_vm2 = vcmask 1022976  }
  0x3b   : > { %v405_v63 = vld [vmem:[%s1388_s19] sm:$0xf0]  ;;  %v370_v0 = vld [vmem:[%s1388_s19] sm:$0xf]  ;;  %v371_v6 = vld [vmem:[%s1388_s19 + $0x8] sm:$0xf] }
  0x3c   : > { %v382_v5 = vld [vmem:[%s1388_s19] sm:$0xf0]  ;;  %v383_v7 = vld [vmem:[%s1388_s19 + $0x8] sm:$0xf0]  ;;  %s1250_s25 = smov 77   ;;  %s1251_s26 = smov 78  }
  0x3d   : > { %s1252_s28 = smov 79   ;;  %vm536_vm3 = vcmask 777216   ;;  %vm355_vm4 = vcmask 916480   ;;  %s1253_s29 = smov 80   ;;  %vm513_vm5 = vcmask 785408   ;;  %vm401_vm6 = vcmask 900096  }
  0x3e   : > { %s1254_s21 = smov 94   ;;  %s1255_s9 = smov 93   ;;  %vm378_vm7 = vcmask 908288   ;;  %vm424_vm8 = vcmask 891904   ;;  %vm740_vm9 = vcmask 629760   ;;  %vm717_vm10 = vcmask 637952  }
  0x3f   : > { %vm792_vm11 = vcmask 1043456   ;;  %vm694_vm12 = vcmask 646144   ;;  %vm671_vm13 = vcmask 654336   ;;  %vm559_vm14 = vcmask 769024  }
  0x40   : > { %vm582_vm15 = vcmask 760832  }
  0x41   : > { %296 = vrot.lane.b32.xlu1 %v292_v9, %s1241_s1  ;;  %282 = vrot.lane.b32.xlu0 %v277_v10, %s1243_s20 }
  0x42   : > { %298 = vrot.lane.b32.xlu2 %v293_v11, %s1241_s1 }
  0x49   : > { %309 = vrot.lane.b32.xlu1 %v304_v12, %s1241_s1  ;;  %307 = vrot.lane.b32.xlu0 %v303_v13, %s1241_s1  ;;  %v733_v13 = vld [vmem:[%s1388_s19 + $0x8] sm:$0xf] }
  0x4a   : > { %318 = vrot.lane.b32.xlu2 %v314_v14, %s1242_s22  ;;  %v732_v14 = vld [vmem:[%s1388_s19] sm:$0xf] }
  0x51   : > { %329 = vrot.lane.b32.xlu1 %v325_v15, %s1242_s22  ;;  %320 = vrot.lane.b32.xlu0 %v315_v16, %s1242_s22  ;;  %v359_v15 = vld [vmem:[%s1388_s19] sm:$0xf0] }
  0x52   : > { %331 = vrot.lane.b32.xlu2 %v326_v17, %s1242_s22 }
  0x59   : > { %342 = vrot.lane.b32.xlu1 %v337_v18, %s1243_s20  ;;  %340 = vrot.lane.b32.xlu0 %v336_v19, %s1243_s20  ;;  %s968_s20 = sshll.u32 %s1384_s6, 4 }
  0x5a   : > { %351 = vrot.lane.b32.xlu2 %v347_v20, %s1244_s27  ;;  %v709_v20 = vld [vmem:[%s1388_s19] sm:$0xf] }
  0x61   : > { %532 = vrot.lane.b32.xlu1 %v528_v21, %s1245_s30  ;;  %353 = vrot.lane.b32.xlu0 %v348_v22, %s1244_s27  ;;  %v360_v21 = vld [vmem:[%s1388_s19 + $0x8] sm:$0xf0]  ;;  %v710_v22 = vld [vmem:[%s1388_s19 + $0x8] sm:$0xf] }
  0x62   : > { %534 = vrot.lane.b32.xlu2 %v529_v23, %s1245_s30 }
  0x69   : > { %546 = vrot.lane.b32.xlu1 %v541_v24, %s1245_s30  ;;  %544 = vrot.lane.b32.xlu0 %v540_v25, %s1245_s30 }
  0x6a   : > { %509 = vrot.lane.b32.xlu2 %v505_v26, %s1246_s4 }
  0x71   : > { %521 = vrot.lane.b32.xlu1 %v517_v27, %s1246_s4  ;;  %511 = vrot.lane.b32.xlu0 %v506_v28, %s1246_s4  ;;  %v722_v28 = vld [vmem:[%s1388_s19 + $0x8] sm:$0xf0] }
  0x72   : > { %523 = vrot.lane.b32.xlu2 %v518_v29, %s1246_s4  ;;  %v721_v29 = vld [vmem:[%s1388_s19] sm:$0xf0] }
  0x79   : > { %489 = vrot.lane.b32.xlu1 %v484_v30, %s1247_s7  ;;  %487 = vrot.lane.b32.xlu0 %v483_v31, %s1247_s7  ;;  %v686_v30 = vld [vmem:[%s1388_s19] sm:$0xf] }
  0x7a   : > { %498 = vrot.lane.b32.xlu2 %v494_v32, %s1248_s10 }
  0x81   : > { %465 = vrot.lane.b32.xlu1 %v461_v33, %s1249_s24  ;;  %500 = vrot.lane.b32.xlu0 %v495_v34, %s1248_s10 }
  0x82   : > { %467 = vrot.lane.b32.xlu2 %v462_v35, %s1249_s24  ;;  %v698_v35 = vld [vmem:[%s1388_s19] sm:$0xf0] }
  0x84   : > { %v258_v36 = vpop.permute.xlu2 %257 }
  0x89   : > { %478 = vrot.lane.b32.xlu1 %v473_v37, %s1247_s7  ;;  %476 = vrot.lane.b32.xlu0 %v472_v38, %s1247_s7  ;;  %v699_v37 = vld [vmem:[%s1388_s19 + $0x8] sm:$0xf0] }
  0x8a   : > { %443 = vrot.lane.b32.xlu2 %v439_v39, %s1244_s27 }
  0x8c   : > { %v260_v40 = vpop.permute.xlu2 %259 }
  0x8d   : > { %v262_v41 = vsel %vm261_vm0, %v258_v36, %v260_v40  ;;  %v687_v36 = vld [vmem:[%s1388_s19 + $0x8] sm:$0xf] }
  0x8e   : > { %264 = vst [vmem:[#allocation2 + $0x10] sm:$0xf] %v262_v41 }
  0x91   : > { %454 = vrot.lane.b32.xlu1 %v450_v42, %s1249_s24  ;;  %445 = vrot.lane.b32.xlu0 %v440_v43, %s1244_s27  ;;  %v664_v43 = vld [vmem:[%s1388_s19 + $0x8] sm:$0xf] }
  0x92   : > { %456 = vrot.lane.b32.xlu2 %v451_v44, %s1249_s24  ;;  %v663_v44 = vld [vmem:[%s1388_s19] sm:$0xf] }
  0x94   : > { %v281_v45 = vpop.permute.xlu2 %280 }
  0x99   : > { %422 = vrot.lane.b32.xlu1 %v417_v48, %s1248_s10  ;;  %420 = vrot.lane.b32.xlu0 %v416_v49, %s1248_s10  ;;  %s225_s10 = scalar_lea.vmem [#allocation8], %s968_s20 }
  0x9a   : > { %432 = vrot.lane.b32.xlu2 %v428_v50, %s1244_s27  ;;  %v641_v50 = vld [vmem:[%s1388_s19 + $0x10] sm:$0xf0] }
  0x9b   : > { %v247_v51 = vpop.permute.xlu1 %246  ;;  %v235_v52 = vpop.permute.xlu0 %234 }
  0x9c   : > { %v299_v53 = vpop.permute.xlu2 %298 }
  0xa1   : > { %397 = vrot.lane.b32.xlu1 %v393_v54, %s1247_s7  ;;  %434 = vrot.lane.b32.xlu0 %v429_v55, %s1244_s27 }
  0xa2   : > { %399 = vrot.lane.b32.xlu2 %v394_v56, %s1247_s7 }
  0xa3   : > { %v249_v57 = vpop.permute.xlu1 %248  ;;  %v237_v58 = vpop.permute.xlu0 %236 }
  0xa4   : > { %v250_v59 = vsel %vm238_vm1, %v247_v51, %v249_v57  ;;  %v239_v60 = vsel %vm238_vm1, %v235_v52, %v237_v58  ;;  %v319_v61 = vpop.permute.xlu2 %318  ;;  %v676_v51 = vld [vmem:[%s1388_s19 + $0x8] sm:$0xf0]  ;;  %v642_v52 = vld [vmem:[%s1388_s19 + $0x18] sm:$0xf0] }
  0xa5   : > { %252 = vst [vmem:[#allocation2 + $0x8] sm:$0xf0] %v250_v59  ;;  %v653_v59 = vld [vmem:[%s1388_s19 + $0x18] sm:$0xf] }
  0xa6   : > { %241 = vst [vmem:[#allocation2 + $0x8] sm:$0xf] %v239_v60  ;;  %v652_v60 = vld [vmem:[%s1388_s19 + $0x10] sm:$0xf] }
  0xa9   : > { %411 = vrot.lane.b32.xlu1 %v406_v62, %s1247_s7  ;;  %409 = vrot.lane.b32.xlu0 %v405_v63, %s1247_s7 }
  0xaa   : > { %374 = vrot.lane.b32.xlu2 %v370_v0, %s1249_s24 }
  0xab   : > { %v272_v1 = vpop.permute.xlu1 %271  ;;  %v270_v2 = vpop.permute.xlu0 %269 }
  0xac   : > { %v273_v3 = vsel %vm261_vm0, %v270_v2, %v272_v1  ;;  %v332_v4 = vpop.permute.xlu2 %331 }
  0xad   : > { %275 = vst [vmem:[#allocation2 + $0x10] sm:$0xf0] %v273_v3  ;;  %v630_v3 = vld [vmem:[%s1388_s19 + $0x10] sm:$0xf] }
  0xb1   : > { %386 = vrot.lane.b32.xlu1 %v382_v5, %s1249_s24  ;;  %376 = vrot.lane.b32.xlu0 %v371_v6, %s1249_s24  ;;  %v631_v5 = vld [vmem:[%s1388_s19 + $0x18] sm:$0xf] }
  0xb2   : > { %388 = vrot.lane.b32.xlu2 %v383_v7, %s1249_s24  ;;  %s858_s24 = sshll.u32 %s225_s10, 4  ;;  %s859_s24 = int_to_ptr.vmem [resolvable:$true] %s858_s24 }
  0xb3   : > { %v297_v8 = vpop.permute.xlu1 %296  ;;  %v283_v9 = vpop.permute.xlu0 %282 }
  0xb4   : > { %v300_v10 = vsel %vm238_vm1, %v297_v8, %v299_v53  ;;  %v285_v11 = vsel %vm284_vm2, %v281_v45, %v283_v9  ;;  %v352_v12 = vpop.permute.xlu2 %351  ;;  %v675_v45 = vld [vmem:[%s1388_s19] sm:$0xf0] }
  0xb5   : > { %302 = vst [vmem:[#allocation2 + $0x24] sm:$0xf] %v300_v10 }
  0xb6   : > { %287 = vst [vmem:[#allocation2 + $0x18] sm:$0xf] %v285_v11  ;;  %v598_v11 = vld [vmem:[%s1388_s19 + $0x18] sm:$0xf0] }
  0xb9   : > { %738 = vrot.lane.b32.xlu1 %v733_v13, %s1250_s25  ;;  %736 = vrot.lane.b32.xlu0 %v732_v14, %s1250_s25  ;;  %v608_v13 = vld [vmem:[%s1388_s19 + $0x10] sm:$0xf] }
  0xba   : > { %363 = vrot.lane.b32.xlu2 %v359_v15, %s1244_s27 }
  0xbb   : > { %v310_v16 = vpop.permute.xlu1 %309  ;;  %v308_v17 = vpop.permute.xlu0 %307 }
  0xbc   : > { %v311_v18 = vsel %vm238_vm1, %v308_v17, %v310_v16  ;;  %v535_v19 = vpop.permute.xlu2 %534 }
  0xbd   : > { %313 = vst [vmem:[#allocation2 + $0x24] sm:$0xf0] %v311_v18 }
  0xc1   : > { %713 = vrot.lane.b32.xlu1 %v709_v20, %s1251_s26  ;;  %365 = vrot.lane.b32.xlu0 %v360_v21, %s1244_s27  ;;  %v609_v20 = vld [vmem:[%s1388_s19 + $0x18] sm:$0xf]  ;;  %v575_v21 = vld [vmem:[%s1388_s19 + $0x8] sm:$0xf]  ;;  %s978_s27 = sshll.u32 %s1228_s15, 4  ;;  %s845_s15 = scalar_lea.sflag [#allocation5], %s1384_s6 }
  0xc2   : > { %715 = vrot.lane.b32.xlu2 %v710_v22, %s1251_s26  ;;  %s857_s7 = scalar_lea.hbm %s1642_s3, %s978_s27 }
  0xc3   : > { %v330_v23 = vpop.permute.xlu1 %329  ;;  %v321_v24 = vpop.permute.xlu0 %320  ;;  %s860_s25 = sshll.u32 %s857_s7, 4  ;;  %s861_s25 = int_to_ptr.hbm [resolvable:$true] %s860_s25 }
  0xc4   : > { %v333_v25 = vsel %vm261_vm0, %v330_v23, %v332_v4  ;;  %v322_v26 = vsel %vm261_vm0, %v319_v61, %v321_v24  ;;  %v510_v27 = vpop.permute.xlu2 %509  ;;  %v619_v61 = vld [vmem:[%s1388_s19 + $0x10] sm:$0xf0]  ;;  %v620_v4 = vld [vmem:[%s1388_s19 + $0x18] sm:$0xf0]  ;;  %vm785_vm0 = vcmask 556032  }
  0xc5   : > { %335 = vst [vmem:[#allocation2 + $0x2c] sm:$0xf0] %v333_v25 }
  0xc6   : > { %324 = vst [vmem:[#allocation2 + $0x2c] sm:$0xf] %v322_v26 }
  0xc9   : > { %727 = vrot.lane.b32.xlu1 %v722_v28, %s1251_s26  ;;  %725 = vrot.lane.b32.xlu0 %v721_v29, %s1251_s26  ;;  %v587_v28 = vld [vmem:[%s1388_s19 + $0x18] sm:$0xf]  ;;  %v586_v29 = vld [vmem:[%s1388_s19 + $0x10] sm:$0xf]  ;;  %s1164_s26 = sshra.s32 %s861_s25, 4  ;;  %s1165_s26 = int_to_ptr.hbm [resolvable:$true] %s1164_s26 }
  0xca   : > { %690 = vrot.lane.b32.xlu2 %v686_v30, %s1252_s28  ;;  %v551_v30 = vld [vmem:[%s1388_s19] sm:$0xf]  ;;  %p1171_p10 = scmp.lt.s32.totalorder %s1165_s26, %s1642_s3 }
  0xcb   : > { %v343_v31 = vpop.permute.xlu1 %342  ;;  %v341_v32 = vpop.permute.xlu0 %340 }
  0xcc   : > { %v344_v33 = vsel %vm284_vm2, %v341_v32, %v343_v31  ;;  %v524_v34 = vpop.permute.xlu2 %523 }
  0xcd   : > { %346 = vst [vmem:[#allocation2 + $0x34] sm:$0xf] %v344_v33 }
  0xd1   : > { %702 = vrot.lane.b32.xlu1 %v698_v35, %s1252_s28  ;;  %692 = vrot.lane.b32.xlu0 %v687_v36, %s1252_s28  ;;  %v563_v36 = vld [vmem:[%s1388_s19] sm:$0xf0] }
  0xd2   : > { %704 = vrot.lane.b32.xlu2 %v699_v37, %s1252_s28  ;;  %v552_v37 = vld [vmem:[%s1388_s19 + $0x8] sm:$0xf]  ;;  %s1166_s28 = scalar_lea.hbm %s1165_s26, 16 }
  0xd3   : > { %v533_v38 = vpop.permute.xlu1 %532  ;;  %v354_v39 = vpop.permute.xlu0 %353  ;;  %p1167_p1 = scmp.ne.s32.totalorder %s1165_s26, %s1166_s28 }
  0xd4   : > { %v537_v40 = vsel %vm536_vm3, %v533_v38, %v535_v19  ;;  %v356_v41 = vsel %vm355_vm4, %v352_v12, %v354_v39  ;;  %v499_v42 = vpop.permute.xlu2 %498  ;;  %v597_v12 = vld [vmem:[%s1388_s19 + $0x10] sm:$0xf0]  ;;  %v574_v19 = vld [vmem:[%s1388_s19] sm:$0xf]  ;;  %v564_v38 = vld [vmem:[%s1388_s19 + $0x8] sm:$0xf0] }
  0xd5   : > { %539 = vst [vmem:[#allocation2 + $0x78] sm:$0xf] %v537_v40  ;;  %p1168_p4 = pnand %p1167_p1, %p1361_p5 }
  0xd6   : > { %358 = vst [vmem:[#allocation2 + $0x38] sm:$0xf] %v356_v41 }
  0xd7   : > { %p1169_p8 = pneg %p1168_p4 }
  0xd9   : > { %669 = vrot.lane.b32.xlu1 %v664_v43, %s1253_s29  ;;  %667 = vrot.lane.b32.xlu0 %v663_v44, %s1253_s29 }
  0xda   : > { %679 = vrot.lane.b32.xlu2 %v675_v45, %s1253_s29 }
  0xdb   : > { %v547_v46 = vpop.permute.xlu1 %546  ;;  %v545_v47 = vpop.permute.xlu0 %544 }
  0xdc   : > { %v548_v48 = vsel %vm536_vm3, %v545_v47, %v547_v46  ;;  %v468_v49 = vpop.permute.xlu2 %467 }
  0xdd   : > { %550 = vst [vmem:[#allocation2 + $0x78] sm:$0xf0] %v548_v48 }
  0xe1   : > { %645 = vrot.lane.b32.xlu1 %v641_v50, %s1254_s21  ;;  %681 = vrot.lane.b32.xlu0 %v676_v51, %s1253_s29 }
  0xe2   : > { %647 = vrot.lane.b32.xlu2 %v642_v52, %s1254_s21 }
  0xe3   : > { %v522_v53 = vpop.permute.xlu1 %521  ;;  %v512_v54 = vpop.permute.xlu0 %511 }
  0xe4   : > { %v525_v55 = vsel %vm513_vm5, %v522_v53, %v524_v34  ;;  %v514_v56 = vsel %vm513_vm5, %v510_v27, %v512_v54  ;;  %v763_v57 = vld [vmem:[#allocation2 + $0x78] sm:$0xff]  ;;  %v444_v58 = vpop.permute.xlu2 %443 }
  0xe5   : > { %527 = vst [vmem:[#allocation2 + $0x70] sm:$0xf0] %v525_v55  ;;  %796 = vmatpush.msra.mxu0 %v763_v57  ;;  %979 = vmatpush.msra.mxu2 %v763_v57 }
  0xe6   : > { %516 = vst [vmem:[#allocation2 + $0x70] sm:$0xf] %v514_v56 }
  0xe9   : > { %658 = vrot.lane.b32.xlu1 %v653_v59, %s1255_s9  ;;  %656 = vrot.lane.b32.xlu0 %v652_v60, %s1255_s9 }
  0xea   : > { %623 = vrot.lane.b32.xlu2 %v619_v61, %s1245_s30 }
  0xeb   : > { %v490_v62 = vpop.permute.xlu1 %489  ;;  %v488_v63 = vpop.permute.xlu0 %487 }
  0xec   : > { %v491_v0 = vsel %vm401_vm6, %v488_v63, %v490_v62  ;;  %v457_v1 = vpop.permute.xlu2 %456 }
  0xed   : > { %493 = vst [vmem:[#allocation2 + $0x64] sm:$0xf0] %v491_v0  ;;  %v762_v2 = vld [vmem:[#allocation2 + $0x70] sm:$0xff] }
  0xee   : > { %797 = vmatpush.msra.mxu0 %v762_v2  ;;  %980 = vmatpush.msra.mxu2 %v762_v2 }
  0xf1   : > { %634 = vrot.lane.b32.xlu1 %v630_v3, %s1254_s21  ;;  %625 = vrot.lane.b32.xlu0 %v620_v4, %s1245_s30 }
  0xf2   : > { %636 = vrot.lane.b32.xlu2 %v631_v5, %s1254_s21 }
  0xf3   : > { %v466_v6 = vpop.permute.xlu1 %465  ;;  %v501_v7 = vpop.permute.xlu0 %500 }
  0xf4   : > { %v469_v8 = vsel %vm378_vm7, %v466_v6, %v468_v49  ;;  %v502_v9 = vsel %vm424_vm8, %v499_v42, %v501_v7  ;;  %v433_v10 = vpop.permute.xlu2 %432  ;;  %v754_v6 = vld [vmem:[#allocation2 + $0x30] sm:$0xff]  ;;  %v753_v7 = vld [vmem:[#allocation2 + $0x28] sm:$0xff] }
  0xf5   : > { %471 = vst [vmem:[#allocation2 + $0x5c] sm:$0xf0] %v469_v8 }
  0xf6   : > { %504 = vst [vmem:[#allocation2 + $0x6c] sm:$0xf] %v502_v9  ;;  %v752_v9 = vld [vmem:[#allocation2 + $0x20] sm:$0xff] }
  0xf9   : > { %603 = vrot.lane.b32.xlu1 %v598_v11, %s1246_s4  ;;  %601 = vrot.lane.b32.xlu0 %v597_v12, %s1246_s4 }
  0xfa   : > { %612 = vrot.lane.b32.xlu2 %v608_v13, %s1245_s30 }
  0xfb   : > { %v479_v14 = vpop.permute.xlu1 %478  ;;  %v477_v15 = vpop.permute.xlu0 %476 }
  0xfc   : > { %v480_v16 = vsel %vm401_vm6, %v477_v15, %v479_v14  ;;  %v400_v17 = vpop.permute.xlu2 %399  ;;  %v751_v15 = vld [vmem:[#allocation2 + $0x18] sm:$0xff] }
  0xfd   : > { %482 = vst [vmem:[#allocation2 + $0x64] sm:$0xf] %v480_v16  ;;  %v761_v18 = vld [vmem:[#allocation2 + $0x68] sm:$0xff]  ;;  %v750_v16 = vld [vmem:[#allocation2 + $0x10] sm:$0xff] }
  0xfe   : > { %798 = vmatpush.msra.mxu0 %v761_v18  ;;  %981 = vmatpush.msra.mxu2 %v761_v18 }
 0x101   : > { %578 = vrot.lane.b32.xlu1 %v574_v19, %s1255_s9  ;;  %614 = vrot.lane.b32.xlu0 %v609_v20, %s1245_s30 }
 0x102   : > { %580 = vrot.lane.b32.xlu2 %v575_v21, %s1255_s9  ;;  %s1170_s9 = scalar_lea.hbm %s1642_s3, 32 }
 0x103   : > { %v455_v22 = vpop.permute.xlu1 %454  ;;  %v446_v23 = vpop.permute.xlu0 %445  ;;  %p1172_p12 = scmp.lt.s32.totalorder %s1170_s9, %s1166_s28 }
 0x104   : > { %v458_v24 = vsel %vm378_vm7, %v455_v22, %v457_v1  ;;  %v447_v25 = vsel %vm355_vm4, %v444_v58, %v446_v23  ;;  %v760_v26 = vld [vmem:[#allocation2 + $0x60] sm:$0xff]  ;;  %v375_v27 = vpop.permute.xlu2 %374 }
 0x105   : > { %460 = vst [vmem:[#allocation2 + $0x5c] sm:$0xf] %v458_v24  ;;  %799 = vmatpush.msra.mxu0 %v760_v26  ;;  %982 = vmatpush.msra.mxu2 %v760_v26  ;;  %p1173_p13 = por %p1172_p12, %p1171_p10 }
 0x106   : > { %449 = vst [vmem:[#allocation2 + $0x54] sm:$0xf0] %v447_v25 }
 0x107   : > { %p1174_p0 = pnand %p1173_p13, %p1169_p8 }
 0x109   : > { %592 = vrot.lane.b32.xlu1 %v587_v28, %s1246_s4  ;;  %590 = vrot.lane.b32.xlu0 %v586_v29, %s1246_s4 }
 0x10a   : > { %555 = vrot.lane.b32.xlu2 %v551_v30, %s1254_s21 }
 0x10b   : > { %v423_v31 = vpop.permute.xlu1 %422  ;;  %v421_v32 = vpop.permute.xlu0 %420 }
 0x10c   : > { %v425_v33 = vsel %vm424_vm8, %v421_v32, %v423_v31  ;;  %v389_v34 = vpop.permute.xlu2 %388 }
 0x10d   : > { %427 = vst [vmem:[#allocation2 + $0x50] sm:$0xf] %v425_v33  ;;  %v759_v35 = vld [vmem:[#allocation2 + $0x58] sm:$0xff] }
 0x10e   : > { %800 = vmatpush.msra.mxu0 %v759_v35  ;;  %983 = vmatpush.msra.mxu2 %v759_v35 }
 0x111   : > { %567 = vrot.lane.b32.xlu1 %v563_v36, %s1254_s21  ;;  %557 = vrot.lane.b32.xlu0 %v552_v37, %s1254_s21 }
 0x112   : > { %569 = vrot.lane.b32.xlu2 %v564_v38, %s1254_s21  ;;  %v226_v38 = vld [vmem:[%s1388_s19] sm:$0xf] }
 0x113   : > { %v398_v39 = vpop.permute.xlu1 %397  ;;  %v435_v40 = vpop.permute.xlu0 %434  ;;  %227 = vst [vmem:[#allocation2] sm:$0xf] %v226_v38 }
 0x114   : > { %v402_v41 = vsel %vm401_vm6, %v398_v39, %v400_v17  ;;  %v436_v42 = vsel %vm355_vm4, %v433_v10, %v435_v40  ;;  %v364_v43 = vpop.permute.xlu2 %363  ;;  %v749_v17 = vld [vmem:[#allocation2 + $0x8] sm:$0xff] }
 0x115   : > { %404 = vst [vmem:[#allocation2 + $0x48] sm:$0xf] %v402_v41  ;;  %v228_v39 = vld [vmem:[%s1388_s19] sm:$0xf0] }
 0x116   : > { %438 = vst [vmem:[#allocation2 + $0x54] sm:$0xf] %v436_v42 }
 0x117   : > { %229 = vst [vmem:[#allocation2] sm:$0xf0] %v228_v39 }
 0x11b   : > { %v412_v44 = vpop.permute.xlu1 %411  ;;  %v410_v45 = vpop.permute.xlu0 %409 }
 0x11c   : > { %v413_v46 = vsel %vm401_vm6, %v410_v45, %v412_v44  ;;  %v716_v47 = vpop.permute.xlu2 %715  ;;  %v744_v45 = vld [vmem:[#allocation6] sm:$0xff] }
 0x11d   : > { %415 = vst [vmem:[#allocation2 + $0x48] sm:$0xf0] %v413_v46  ;;  %v758_v48 = vld [vmem:[#allocation2 + $0x50] sm:$0xff]  ;;  %v746_v46 = vld [vmem:[#allocation6 + $0x10] sm:$0xff] }
 0x11e   : > { %801 = vmatpush.msra.mxu0 %v758_v48  ;;  %984 = vmatpush.msra.mxu2 %v758_v48  ;;  %v1256_v48 = vmov 0  }
 0x11f   : > { %1088 = vset.pattern.permute.xlu0 %v1256_v48  ;;  %1089 = vset.pattern.permute.xlu1 %v1256_v48 }
 0x123   : > { %v387_v49 = vpop.permute.xlu1 %386  ;;  %v377_v50 = vpop.permute.xlu0 %376 }
 0x124   : > { %v390_v51 = vsel %vm378_vm7, %v387_v49, %v389_v34  ;;  %v379_v52 = vsel %vm378_vm7, %v375_v27, %v377_v50  ;;  %v757_v53 = vld [vmem:[#allocation2 + $0x48] sm:$0xff]  ;;  %v691_v54 = vpop.permute.xlu2 %690 }
 0x125   : > { %392 = vst [vmem:[#allocation2 + $0x40] sm:$0xf0] %v390_v51  ;;  %802 = vmatpush.msra.mxu0 %v757_v53  ;;  %985 = vmatpush.msra.mxu2 %v757_v53 }
 0x126   : > { %381 = vst [vmem:[#allocation2 + $0x40] sm:$0xf] %v379_v52 }
 0x12b   : > { %v739_v55 = vpop.permute.xlu1 %738  ;;  %v737_v56 = vpop.permute.xlu0 %736 }
 0x12c   : > { %v741_v57 = vsel %vm740_vm9, %v737_v56, %v739_v55  ;;  %v705_v59 = vpop.permute.xlu2 %704  ;;  %v774_v55 = vld [vmem:[%s1641_s2 + $0x8] sm:$0xff] }
 0x12d   : > { %743 = vst [vmem:[#allocation2 + $0xc0] sm:$0xf] %v741_v57  ;;  %v756_v58 = vld [vmem:[#allocation2 + $0x40] sm:$0xff]  ;;  %782 = vperm.xlu1 %1089, %v774_v55  }
 0x12e   : > { %803 = vmatpush.msra.mxu0 %v756_v58  ;;  %986 = vmatpush.msra.mxu2 %v756_v58 }
 0x133   : > { %v714_v60 = vpop.permute.xlu1 %713  ;;  %v366_v61 = vpop.permute.xlu0 %365 }
 0x134   : > { %v718_v62 = vsel %vm717_vm10, %v714_v60, %v716_v47  ;;  %v367_v63 = vsel %vm355_vm4, %v364_v43, %v366_v61  ;;  %v772_v0 = vld [vmem:[#allocation2 + $0xc0] sm:$0xf]  ;;  %v680_v1 = vpop.permute.xlu2 %679 }
 0x135   : > { %720 = vst [vmem:[#allocation2 + $0xb8] sm:$0xf] %v718_v62  ;;  %969 = vmatpush.msk.msra.mxu1 %vm792_vm11, %v772_v0  ;;  %v748_v47 = vld [vmem:[#allocation2] sm:$0xff] }
 0x136   : > { %369 = vst [vmem:[#allocation2 + $0x38] sm:$0xf0] %v367_v63 }
 0x13b   : > { %v728_v2 = vpop.permute.xlu1 %727  ;;  %v726_v3 = vpop.permute.xlu0 %725 }
 0x13c   : > { %v729_v4 = vsel %vm717_vm10, %v726_v3, %v728_v2  ;;  %v648_v14 = vpop.permute.xlu2 %647  ;;  %v745_v2 = vld [vmem:[#allocation6 + $0x8] sm:$0xff] }
 0x13d   : > { %731 = vst [vmem:[#allocation2 + $0xb8] sm:$0xf0] %v729_v4  ;;  %v755_v5 = vld [vmem:[#allocation2 + $0x38] sm:$0xff]  ;;  %v747_v4 = vld [vmem:[#allocation6 + $0x18] sm:$0xff] }
 0x13e   : > { %804 = vmatpush.msra.mxu0 %v755_v5  ;;  %987 = vmatpush.msra.mxu2 %v755_v5 }
 0x140   : > { %805 = vmatpush.msra.mxu0 %v754_v6  ;;  %988 = vmatpush.msra.mxu2 %v754_v6 }
 0x142   : > { %806 = vmatpush.msra.mxu0 %v753_v7  ;;  %989 = vmatpush.msra.mxu2 %v753_v7 }
 0x143   : > { %v703_v8 = vpop.permute.xlu1 %702  ;;  %v693_v10 = vpop.permute.xlu0 %692 }
 0x144   : > { %v706_v11 = vsel %vm694_vm12, %v703_v8, %v705_v59  ;;  %807 = vmatpush.msra.mxu0 %v752_v9  ;;  %990 = vmatpush.msra.mxu2 %v752_v9  ;;  %v695_v12 = vsel %vm694_vm12, %v691_v54, %v693_v10  ;;  %v771_v13 = vld [vmem:[#allocation2 + $0xb8] sm:$0xff]  ;;  %v624_v22 = vpop.permute.xlu2 %623  ;;  %v773_v54 = vld [vmem:[%s1641_s2] sm:$0xff] }
 0x145   : > { %708 = vst [vmem:[#allocation2 + $0xb0] sm:$0xf0] %v706_v11  ;;  %827 = vmatpush.msra.mxu1 %v771_v13  ;;  %777 = vperm.xlu0 %1088, %v773_v54  }
 0x146   : > { %697 = vst [vmem:[#allocation2 + $0xb0] sm:$0xf] %v695_v12  ;;  %808 = vmatpush.msra.mxu0 %v751_v15  ;;  %991 = vmatpush.msra.mxu2 %v751_v15 }
 0x148   : > { %809 = vmatpush.msra.mxu0 %v750_v16  ;;  %992 = vmatpush.msra.mxu2 %v750_v16 }
 0x14a   : > { %810 = vmatpush.msra.mxu0 %v749_v17  ;;  %993 = vmatpush.msra.mxu2 %v749_v17 }
 0x14b   : > { %v670_v18 = vpop.permute.xlu1 %669  ;;  %v668_v19 = vpop.permute.xlu0 %667 }
 0x14c   : > { %v672_v20 = vsel %vm671_vm13, %v668_v19, %v670_v18  ;;  %v637_v27 = vpop.permute.xlu2 %636  ;;  %811 = vmatpush.msra.mxu0 %v748_v47  ;;  %994 = vmatpush.msra.mxu2 %v748_v47 }
 0x14d   : > { %674 = vst [vmem:[#allocation2 + $0xa8] sm:$0xf] %v672_v20  ;;  %v770_v21 = vld [vmem:[#allocation2 + $0xb0] sm:$0xff]  ;;  %812 = vmatmul.f32.vlgmr.msra.gmra.mxu0 %v744_v45  ;;  %815 = vmatmul.f32.vlgmr.msra.gmra.mxu2 %v746_v46 }
 0x14e   : > { %828 = vmatpush.msra.mxu1 %v770_v21 }
 0x153   : > { %v646_v23 = vpop.permute.xlu1 %645  ;;  %v682_v24 = vpop.permute.xlu0 %681 }
 0x154   : > { %v649_v25 = vsel %vm559_vm14, %v646_v23, %v648_v14  ;;  %v683_v26 = vsel %vm671_vm13, %v680_v1, %v682_v24  ;;  %v613_v32 = vpop.permute.xlu2 %612 }
 0x155   : > { %651 = vst [vmem:[#allocation2 + $0x9c] sm:$0xf0] %v649_v25 }
 0x156   : > { %685 = vst [vmem:[#allocation2 + $0xa8] sm:$0xf0] %v683_v26 }
 0x15b   : > { %v659_v28 = vpop.permute.xlu1 %658  ;;  %v657_v29 = vpop.permute.xlu0 %656 }
 0x15c   : > { %v660_v30 = vsel %vm582_vm15, %v657_v29, %v659_v28  ;;  %v581_v44 = vpop.permute.xlu2 %580 }
 0x15d   : > { %662 = vst [vmem:[#allocation2 + $0xa4] sm:$0xf] %v660_v30  ;;  %v769_v31 = vld [vmem:[#allocation2 + $0xa8] sm:$0xff] }
 0x15e   : > { %829 = vmatpush.msra.mxu1 %v769_v31 }
 0x163   : > { %v635_v33 = vpop.permute.xlu1 %634  ;;  %v626_v34 = vpop.permute.xlu0 %625 }
 0x164   : > { %v638_v35 = vsel %vm559_vm14, %v635_v33, %v637_v27  ;;  %v627_v36 = vsel %vm536_vm3, %v624_v22, %v626_v34  ;;  %v768_v37 = vld [vmem:[#allocation2 + $0xa0] sm:$0xff]  ;;  %v556_v53 = vpop.permute.xlu2 %555 }
 0x165   : > { %640 = vst [vmem:[#allocation2 + $0x9c] sm:$0xf] %v638_v35  ;;  %830 = vmatpush.msra.mxu1 %v768_v37 }
 0x166   : > { %629 = vst [vmem:[#allocation2 + $0x94] sm:$0xf0] %v627_v36 }
 0x16b   : > { %v604_v40 = vpop.permute.xlu1 %603  ;;  %v602_v41 = vpop.permute.xlu0 %601 }
 0x16c   : > { %v605_v42 = vsel %vm513_vm5, %v602_v41, %v604_v40  ;;  %v570_v60 = vpop.permute.xlu2 %569 }
 0x16d   : > { %607 = vst [vmem:[#allocation2 + $0x8c] sm:$0xf0] %v605_v42  ;;  %v767_v43 = vld [vmem:[#allocation2 + $0x98] sm:$0xff] }
 0x16e   : > { %831 = vmatpush.msra.mxu1 %v767_v43 }
 0x173   : > { %v579_v49 = vpop.permute.xlu1 %578  ;;  %v615_v50 = vpop.permute.xlu0 %614 }
 0x174   : > { %v583_v51 = vsel %vm582_vm15, %v579_v49, %v581_v44  ;;  %v616_v52 = vsel %vm536_vm3, %v613_v32, %v615_v50 }
 0x175   : > { %585 = vst [vmem:[#allocation2 + $0x88] sm:$0xf] %v583_v51 }
 0x176   : > { %618 = vst [vmem:[#allocation2 + $0x94] sm:$0xf] %v616_v52 }
 0x17b   : > { %v593_v56 = vpop.permute.xlu1 %592  ;;  %v591_v57 = vpop.permute.xlu0 %590 }
 0x17c   : > { %v594_v58 = vsel %vm513_vm5, %v591_v57, %v593_v56 }
 0x17d   : > { %596 = vst [vmem:[#allocation2 + $0x8c] sm:$0xf] %v594_v58  ;;  %v766_v59 = vld [vmem:[#allocation2 + $0x90] sm:$0xff] }
 0x17e   : > { %832 = vmatpush.msra.mxu1 %v766_v59 }
 0x183   : > { %v568_v61 = vpop.permute.xlu1 %567  ;;  %v558_v62 = vpop.permute.xlu0 %557 }
 0x184   : > { %v571_v63 = vsel %vm559_vm14, %v568_v61, %v570_v60  ;;  %v560_v0 = vsel %vm559_vm14, %v556_v53, %v558_v62  ;;  %v765_v1 = vld [vmem:[#allocation2 + $0x88] sm:$0xff] }
 0x185   : > { %573 = vst [vmem:[#allocation2 + $0x80] sm:$0xf0] %v571_v63  ;;  %833 = vmatpush.msra.mxu1 %v765_v1 }
 0x186   : > { %562 = vst [vmem:[#allocation2 + $0x80] sm:$0xf] %v560_v0 }
 0x18d   : > { %v764_v3 = vld [vmem:[#allocation2 + $0x80] sm:$0xff] }
 0x18e   : > { %834 = vmatpush.msra.mxu1 %v764_v3 }
 0x18f   : > { %970 = vmatmul.msk.f32.vlgmr.msra.gmra.mxu1 %vm785_vm0, %v745_v2 }
 0x197   : > { %971 = vmatmul.msk.f32.gmra.mxu1 %vm785_vm0, %v747_v4 }
 0x19f   : > { %v783_v10 = vpop.permute.xlu1 %782 }
 0x1b7   : > { %v778_v5 = vpop.permute.xlu0 %777 }
 0x1ca   : > { %v813_v6 = vpop.f32.mrf.mxu0 }
 0x1cb   : > { %v814_v7 = vadd.f32 %v813_v6, %v778_v5 }
 0x1d0   : > { %v816_v11 = vpop.f32.mrf.mxu2 }
 0x1d1   : > { %v817_v12 = vadd.f32 %v816_v11, %v783_v10 }
 0x20c   : > { %v836_v8 = vpop.f32.mrf.mxu1 }
 0x20d   : > { %v837_v9 = vadd.f32 %v836_v8, %v814_v7 }
 0x20f   : > { %842 = vst [vmem:[%s225_s10] sm:$0xff] %v837_v9 }
 0x214   : > { %v839_v13 = vpop.f32.mrf.mxu1 }
 0x215   : > { %v840_v14 = vadd.f32 %v839_v13, %v817_v12 }
 0x217   : > { %843 = vst [vmem:[%s225_s10 + $0x8] sm:$0xff] %v840_v14 }
 0x218   : > { %1177 = shalt.err (!%p1174_p0)
}
 0x219   : > { %s1257_s6 = smov 128   ;;  %s1258_s1 = smov 8  }
 0x21a   : > { %1001 = dma.vmem_to_hbm [thread:$0]  (%p1361_p5), %s859_s24, 256, %s861_s25, %s845_s15, %s1257_s6, %s1257_s6, %s1258_s1  }
 0x21b PF: > { %s875_s22 = sand.u32 1, %s1216_s12   ;;  %p1012_p3 = pnand %p961_p11, %p1328_p6 }
 0x21c   : > { %s876_s20 = scalar_lea.sflag [#allocation5], %s875_s22 }
 0x21d   : > { %p1013_p7 = pneg %p1012_p3 }
 0x21f   : > { %1211 = dma.done.wait (%p1013_p7), %s876_s20, 256  }
 0x220   : > { %1213 = vsyncadd (%p1013_p7), %s876_s20, 4294967040  ;;  %s20_s17 = sadd.s32 1, %s1236_s17   ;;  %s1654_s12 = smov %s1220_s13 }
 0x221   : > { %p17_p9 = scmp.ge.s32.totalorder %s20_s17, 4   ;;  %s1655_s13 = smov %s1224_s14 }
 0x222   : > { %s1656_s14 = smov %s1370_s18  ;;  %s1657_s15 = smov %s1232_s16 }
 0x223   : > { %s1658_s16 = smov %s1660_s5  ;;  %19 = sbr.rel (!%p17_p9) target bundleno = 9 (0x9), region = 81 }
 0x228   :  { %882 = vsyncpa [#allocation4], 1 }
 0x229   :  { %884 = vsyncpa [#allocation4 + $0x1], 1 }
 0x22a   :  { %885 = vsyncpa [#allocation7], 1 }
 0x22b   :  { %886 = vsyncpa [#allocation5], 1 }
 0x22c   :  { %888 = vsyncpa [#allocation5 + $0x1], 1 }

</bundles_post_ra>
